<compile_context>
chip_gen: v5e
topology: v5e:2x2
jax: 0.10.0
libtpu: 0.0.40
codegen_flags: <defaults>
</compile_context>

<pallas_src>
import functools

import jax
import jax.numpy as jnp
from jax import lax
from jax.experimental import pallas as pl
from jax.experimental.pallas import tpu as pltpu

BN_EPS = 1e-5


# ----------------------------------------------------------------------------
# Hardware-aware tile sizing.
# ----------------------------------------------------------------------------
def _vmem_capacity_bytes():
    try:
        cap = getattr(pltpu.get_tpu_info(), "vmem_capacity_bytes", None)
        if cap:
            return int(cap)
    except Exception:
        pass
    return 128 * 1024 * 1024


def _pick_nt(N, H, L, Wo, budget_bytes):
    """Largest divisor of N whose per-grid-step VMEM working set fits the budget,
    capped at N//2 so both v7x TensorCores always get a 'parallel' grid step."""
    def vmem_need(nt):
        conv = (2 * nt * H * L * 2            # input block (double-buffered, bf16)
                + nt * (H + 2) * L * 2        # halo-padded VMEM scratch
                + 2 * nt * H * Wo * 4         # f32 conv output block (double-buffered)
                + 2 * 3 * L * Wo * 2          # resident Toeplitz weights
                + 3 * nt * H * (L + Wo) * 4)  # tap copies / f32 accumulator temps
        ghost = (2 * nt * H * Wo * 4          # conv-output block
                 + 4 * nt * H * L * 2         # residual in + combined out blocks
                 + 2 * nt * H * Wo * 2        # slice-mean output block
                 + 4 * nt * H * L * 4)        # f32 elementwise temporaries
        return max(conv, ghost)

    nt = max(1, N // 2)
    while nt > 1 and (N % nt != 0 or vmem_need(nt) > budget_bytes):
        nt -= 1
    return nt
# TODO(synk): for very large H*W a second ("parallel") grid axis over H with
#             halo rows would be needed to keep blocks within VMEM (esp. v7x).


# ----------------------------------------------------------------------------
# Kernel 1: grouped binary-weight 3x3 conv (stride 1, pad 1) + BN batch stats.
# One image tile per grid step; all S groups / 9 taps / W-padding are folded
# into three resident Toeplitz weights, so the kernel is 3 accumulating MXU
# matmuls.  Output is (NT, H, W*Co) f32, lane-dense.
# ----------------------------------------------------------------------------
def _conv_kernel(x_ref, w_ref, a_ref, y_ref, s1_ref, s2_ref, xpad_ref, *, H):
    NT, _, L = x_ref.shape
    Wo = y_ref.shape[-1]

    # in-kernel halo pad (H direction only; W padding lives in the weight zeros)
    zrow = jnp.zeros((NT, 1, L), x_ref.dtype)
    xpad_ref[:, 0:1, :] = zrow
    xpad_ref[:, H + 1:H + 2, :] = zrow
    xpad_ref[:, 1:H + 1, :] = x_ref[...]

    acc = jnp.zeros((NT * H, Wo), jnp.float32)
    for dy in range(3):                                   # static, unrolled
        tap = xpad_ref[:, dy:dy + H, :].reshape(NT * H, L)        # bf16 (M, S*W*C)
        acc = acc + jnp.dot(tap, w_ref[dy], preferred_element_type=jnp.float32)
    # TODO(synk): on v5e/v6e an int8 MXU path (and fp8 on v7x) is possible since
    #             all operands are exactly +/-1; kept bf16 for portability.

    y = acc * a_ref[...]                                   # per-out-channel alpha

    # per-channel partial batch statistics for the following BatchNorm
    s1_ref[...] = jnp.sum(y, axis=0, keepdims=True).reshape(1, 1, Wo)
    s2_ref[...] = jnp.sum(y * y, axis=0, keepdims=True).reshape(1, 1, Wo)

    y_ref[...] = y.reshape(NT, H, Wo).astype(y_ref.dtype)


def multib_conv(x, w_toe, alpha_l, *, H, nt, vmem_limit):
    # x: (N, H, L=S*W*C) bf16 ; w_toe: (3, L, Wo=W*Co) bf16 ; alpha_l: (1, Wo) f32
    N, _, L = x.shape
    Wo = alpha_l.shape[-1]
    num_nt = N // nt
    return pl.pallas_call(
        functools.partial(_conv_kernel, H=H),
        out_shape=(jax.ShapeDtypeStruct((N, H, Wo), jnp.float32),
                   jax.ShapeDtypeStruct((num_nt, 1, Wo), jnp.float32),
                   jax.ShapeDtypeStruct((num_nt, 1, Wo), jnp.float32)),
        grid_spec=pltpu.PrefetchScalarGridSpec(
            num_scalar_prefetch=0,
            grid=(num_nt,),
            in_specs=[
                pl.BlockSpec((nt, H, L), lambda i: (i, 0, 0)),
                pl.BlockSpec((3, L, Wo), lambda i: (0, 0, 0)),    # resident weights
                pl.BlockSpec((1, Wo), lambda i: (0, 0)),          # resident alpha
            ],
            out_specs=(pl.BlockSpec((nt, H, Wo), lambda i: (i, 0, 0)),
                       pl.BlockSpec((1, 1, Wo), lambda i: (i, 0, 0)),
                       pl.BlockSpec((1, 1, Wo), lambda i: (i, 0, 0))),
            scratch_shapes=[pltpu.VMEM((nt, H + 2, L), jnp.bfloat16)]),
        compiler_params=pltpu.CompilerParams(
            dimension_semantics=("parallel",), vmem_limit_bytes=vmem_limit),
    )(x, w_toe, alpha_l)


# ----------------------------------------------------------------------------
# Kernel 2: fused BatchNorm(apply precomputed scale/bias) + GhostSign + XNOR/OR
# with the residual.  All S slices produced by one lane-wide elementwise pass;
# the BN'd activation is computed exactly once.  Optionally also emits the
# slice-mean (+ its BN partial stats) for the last-block path.
# ----------------------------------------------------------------------------
def _ghost_combine_kernel(y_ref, res_ref, sc_ref, bi_ref, thr_ref, *out_refs,
                          S, op, want_mean):
    o_ref = out_refs[0]
    NT, H, Wo = y_ref.shape

    ybn = y_ref[...] * sc_ref[...] + bi_ref[...]                 # (NT,H,Wo) f32
    grep = jnp.concatenate([ybn] * S, axis=-1)                   # (NT,H,S*Wo)
    g = jnp.where(grep + thr_ref[...] >= 0.0, 1.0, -1.0)         # GhostSign, all slices
    r = res_ref[...].astype(jnp.float32)
    if op == "xnor":
        v = g * r
    else:   # OR(x, y) = clamp((x+1)/2 + (y+1)/2, 0, 1)*2 - 1
        v = jnp.clip(0.5 * (g + 1.0) + 0.5 * (r + 1.0), 0.0, 1.0) * 2.0 - 1.0
    o_ref[...] = v.astype(o_ref.dtype)                           # lane-dense store

    if want_mean:
        xm_ref, xs1_ref, xs2_ref = out_refs[1], out_refs[2], out_refs[3]
        acc = v[..., 0:Wo]
        for s in range(1, S):                                    # aligned 128-lane slices
            acc = acc + v[..., s * Wo:(s + 1) * Wo]
        xm = acc * (1.0 / S)                                     # mean over ghost slices
        xm_ref[...] = xm.astype(xm_ref.dtype)
        xm2 = xm.reshape(NT * H, Wo)
        xs1_ref[...] = jnp.sum(xm2, axis=0, keepdims=True).reshape(1, 1, Wo)
        xs2_ref[...] = jnp.sum(xm2 * xm2, axis=0, keepdims=True).reshape(1, 1, Wo)


def ghost_combine(y, res, scale, bias, thr, *, S, op, want_mean, nt, vmem_limit):
    N, H, Wo = y.shape
    L = res.shape[-1]
    num_nt = N // nt
    out_shapes = [jax.ShapeDtypeStruct((N, H, L), jnp.bfloat16)]
    out_specs = [pl.BlockSpec((nt, H, L), lambda i: (i, 0, 0))]
    if want_mean:
        out_shapes += [jax.ShapeDtypeStruct((N, H, Wo), jnp.bfloat16),
                       jax.ShapeDtypeStruct((num_nt, 1, Wo), jnp.float32),
                       jax.ShapeDtypeStruct((num_nt, 1, Wo), jnp.float32)]
        out_specs += [pl.BlockSpec((nt, H, Wo), lambda i: (i, 0, 0)),
                      pl.BlockSpec((1, 1, Wo), lambda i: (i, 0, 0)),
                      pl.BlockSpec((1, 1, Wo), lambda i: (i, 0, 0))]
    return pl.pallas_call(
        functools.partial(_ghost_combine_kernel, S=S, op=op, want_mean=want_mean),
        out_shape=tuple(out_shapes),
        grid_spec=pltpu.PrefetchScalarGridSpec(
            num_scalar_prefetch=0,
            grid=(num_nt,),
            in_specs=[
                pl.BlockSpec((nt, H, Wo), lambda i: (i, 0, 0)),   # conv output (f32)
                pl.BlockSpec((nt, H, L), lambda i: (i, 0, 0)),    # residual
                pl.BlockSpec((1, Wo), lambda i: (0, 0)),          # bn scale (lane-tiled)
                pl.BlockSpec((1, Wo), lambda i: (0, 0)),          # bn bias
                pl.BlockSpec((1, L), lambda i: (0, 0)),           # ghost thr (lane-tiled)
            ],
            out_specs=tuple(out_specs)),
        compiler_params=pltpu.CompilerParams(
            dimension_semantics=("parallel",), vmem_limit_bytes=vmem_limit),
    )(y, res, scale, bias, thr)


# ----------------------------------------------------------------------------
# Kernel 3: last-block tail: bn2(z) + bn3(mean over slices of x), both as
# precomputed per-channel scale/bias applied to lane-dense activations.
# ----------------------------------------------------------------------------
def _last_tail_kernel(z_ref, xm_ref, s2_ref, b2_ref, s3_ref, b3_ref, o_ref):
    z = z_ref[...]
    xm = xm_ref[...].astype(jnp.float32)
    o_ref[...] = (z * s2_ref[...] + b2_ref[...]) + (xm * s3_ref[...] + b3_ref[...])


def last_tail(z, xm, s2, b2, s3, b3, *, nt, vmem_limit):
    N, H, Wo = z.shape
    num_nt = N // nt
    return pl.pallas_call(
        _last_tail_kernel,
        out_shape=jax.ShapeDtypeStruct((N, H, Wo), jnp.float32),
        grid_spec=pltpu.PrefetchScalarGridSpec(
            num_scalar_prefetch=0,
            grid=(num_nt,),
            in_specs=[pl.BlockSpec((nt, H, Wo), lambda i: (i, 0, 0)),
                      pl.BlockSpec((nt, H, Wo), lambda i: (i, 0, 0)),
                      pl.BlockSpec((1, Wo), lambda i: (0, 0)),
                      pl.BlockSpec((1, Wo), lambda i: (0, 0)),
                      pl.BlockSpec((1, Wo), lambda i: (0, 0)),
                      pl.BlockSpec((1, Wo), lambda i: (0, 0))],
            out_specs=pl.BlockSpec((nt, H, Wo), lambda i: (i, 0, 0))),
        compiler_params=pltpu.CompilerParams(
            dimension_semantics=("parallel",), vmem_limit_bytes=vmem_limit),
    )(z, xm, s2, b2, s3, b3)


# ----------------------------------------------------------------------------
# Glue: binary-weight Toeplitz packing, BN scale/bias from accumulated stats.
# ----------------------------------------------------------------------------
def _prep_w(w, S, W):
    """Binarize (wb=True) and pack the grouped 3x3 weight into 3 per-dy
    Toeplitz matrices of shape (S*W*C, W*Co): rows = (s, w_in, c),
    cols = (w_out, co).  Group structure and W zero-padding are encoded as
    zero blocks, so the conv kernel is a plain accumulating matmul."""
    Co, C = w.shape[0], w.shape[1]
    Cog = Co // S
    alpha = jnp.mean(jnp.abs(w), axis=(1, 2, 3)).astype(jnp.float32)     # (Co,)
    wsign = jnp.where(w >= 0, 1.0, -1.0).astype(jnp.float32)             # (Co,C,3,3)

    blk = jnp.transpose(wsign, (2, 3, 1, 0))                             # (3,3,C,Co)
    gmask = (jnp.arange(Co)[None, :] // Cog ==
             jnp.arange(S)[:, None]).astype(jnp.float32)                 # (S,Co)
    blk = blk[:, :, None, :, :] * gmask[None, None, :, None, :]          # (3,3,S,C,Co)

    dx = jnp.arange(W)[:, None] - jnp.arange(W)[None, :] + 1             # (Win,Wout)
    valid = ((dx >= 0) & (dx <= 2)).astype(jnp.float32)
    toe = blk[:, jnp.clip(dx, 0, 2)]                                     # (3,Win,Wout,S,C,Co)
    toe = toe * valid[None, :, :, None, None, None]
    toe = jnp.transpose(toe, (0, 3, 1, 4, 2, 5)).reshape(3, S * W * C, W * Co)

    alpha_l = jnp.tile(alpha, (W,))[None, :]                             # (1, W*Co)
    return toe.astype(jnp.bfloat16), alpha_l
    # TODO(synk): the Toeplitz weight scales as S*W^2*C*Co; for large W, tile W
    #             into lane-sized chunks (or fall back to per-tap block-diag dots).


def _bn_scale_bias(s_sum, s_sq, W, C, count, gamma, beta):
    tot = jnp.sum(s_sum.reshape(-1, W, C), axis=(0, 1))                  # (C,)
    tot2 = jnp.sum(s_sq.reshape(-1, W, C), axis=(0, 1))
    mean = tot / count
    var = jnp.maximum(tot2 / count - mean * mean, 0.0)                   # biased (training BN)
    scale = gamma.astype(jnp.float32) * lax.rsqrt(var + BN_EPS)
    bias = beta.astype(jnp.float32) - mean * scale
    return jnp.tile(scale, (W,))[None, :], jnp.tile(bias, (W,))[None, :]  # (1, W*C)


def basic_block_forward(x, params, last_block=False):
    N, S, C, H, W = x.shape
    Co = params["conv1_w"].shape[0]
    assert Co == C and Co % S == 0, "stride=1 / no-downsample residual requires Co == C"
    L = S * W * C
    Wo = W * Co

    w1, a1 = _prep_w(params["conv1_w"], S, W)
    w2, a2 = _prep_w(params["conv2_w"], S, W)

    # lane-dense layout: (N, H, S*W*C), lane index = s*W*C + w*C + c
    xl = jnp.transpose(x, (0, 3, 1, 4, 2)).reshape(N, H, L).astype(jnp.bfloat16)
    res = xl                                                   # residual = block input

    cap = _vmem_capacity_bytes()
    vmem_limit = min(int(cap * 0.5), 100 * 1024 * 1024)
    nt = _pick_nt(N, H, L, Wo, int(vmem_limit * 0.6))
    count = float(N * H * W)

    thr1 = jnp.tile(params["ghost1_thr"][:, None, :], (1, W, 1)).reshape(1, L).astype(jnp.float32)
    thr2 = jnp.tile(params["ghost2_thr"][:, None, :], (1, W, 1)).reshape(1, L).astype(jnp.float32)

    # conv1 (+ per-channel batch stats for bn1)
    y1, s1a, s1b = multib_conv(xl, w1, a1, H=H, nt=nt, vmem_limit=vmem_limit)
    sc1, bi1 = _bn_scale_bias(s1a, s1b, W, Co, count, params["bn1_g"], params["bn1_b"])

    # bn1 + ghostsign1 + XNOR(residual); also emit slice-mean (+stats) if needed
    g1 = ghost_combine(y1, res, sc1, bi1, thr1, S=S, op="xnor",
                       want_mean=last_block, nt=nt, vmem_limit=vmem_limit)
    x2 = g1[0]                                                 # (N,H,L) bf16, +/-1 exact

    # conv2 (+ stats for bn2)
    y2, s2a, s2b = multib_conv(x2, w2, a2, H=H, nt=nt, vmem_limit=vmem_limit)
    sc2, bi2 = _bn_scale_bias(s2a, s2b, W, Co, count, params["bn2_g"], params["bn2_b"])

    if last_block:
        xm, xs1, xs2 = g1[1], g1[2], g1[3]
        sc3, bi3 = _bn_scale_bias(xs1, xs2, W, Co, count, params["bn3_g"], params["bn3_b"])
        out = last_tail(y2, xm, sc2, bi2, sc3, bi3, nt=nt, vmem_limit=vmem_limit)
        out = out.reshape(N, H, W, Co)
        return jnp.transpose(out, (0, 3, 1, 2))                # (N, C, H, W) f32
    else:
        g2 = ghost_combine(y2, res, sc2, bi2, thr2, S=S, op="or",
                           want_mean=False, nt=nt, vmem_limit=vmem_limit)
        out = g2[0].reshape(N, H, S, W, C).astype(jnp.float32)  # cast rides the transpose
        return jnp.transpose(out, (0, 2, 4, 1, 3))              # (N, S, C, H, W) f32


basic_block_forward = jax.jit(basic_block_forward, static_argnames=("last_block",))


if __name__ == "__main__":
    N, S, C, H, W = 2, 4, 16, 8, 8   # max_slices=4, in_channels=out_channels=16
    key = jax.random.PRNGKey(0)
    ks = jax.random.split(key, 11)
    x = jnp.where(jax.random.normal(ks[0], (N, S, C, H, W)) >= 0, 1.0, -1.0)
    x = x.astype(jnp.float32)

    params = {
        "conv1_w": 0.1 * jax.random.normal(ks[1], (C, C, 3, 3), jnp.float32),
        "conv2_w": 0.1 * jax.random.normal(ks[2], (C, C, 3, 3), jnp.float32),
        "bn1_g": 1.0 + 0.1 * jax.random.normal(ks[3], (C,), jnp.float32),
        "bn1_b": 0.1 * jax.random.normal(ks[4], (C,), jnp.float32),
        "bn2_g": 1.0 + 0.1 * jax.random.normal(ks[5], (C,), jnp.float32),
        "bn2_b": 0.1 * jax.random.normal(ks[6], (C,), jnp.float32),
        "bn3_g": 1.0 + 0.1 * jax.random.normal(ks[7], (C,), jnp.float32),
        "bn3_b": 0.1 * jax.random.normal(ks[8], (C,), jnp.float32),
        "ghost1_thr": 0.1 * jax.random.normal(ks[9], (S, C), jnp.float32),
        "ghost2_thr": 0.1 * jax.random.normal(ks[10], (S, C), jnp.float32),
    }

    out = jax.block_until_ready(basic_block_forward(x, params, last_block=False))
    out_last = jax.block_until_ready(basic_block_forward(x, params, last_block=True))
    assert out.shape == (N, S, C, H, W) and out.dtype == jnp.float32
    assert out_last.shape == (N, C, H, W) and out_last.dtype == jnp.float32
    print("KERNEL_OK")
</pallas_src>

<mosaic_0001>
module attributes {stable_mosaic.version = 11 : i64} {
  func.func @_conv_kernel(%arg0: i32, %arg1: memref<1x8x512xbf16, #tpu.memory_space<vmem>>, %arg2: memref<3x512x128xbf16, #tpu.memory_space<vmem>>, %arg3: memref<1x128xf32, #tpu.memory_space<vmem>>, %arg4: memref<1x8x128xf32, #tpu.memory_space<vmem>>, %arg5: memref<1x1x128xf32, #tpu.memory_space<vmem>>, %arg6: memref<1x1x128xf32, #tpu.memory_space<vmem>>, %arg7: memref<1x10x512xbf16, #tpu.memory_space<vmem>>) attributes {dimension_semantics = [#tpu.dimension_semantics<parallel>], iteration_bounds = array<i64: 2>, scalar_prefetch = 0 : i64, scratch_operands = 1 : i64, tpu.core_type = #tpu.core_type<tc>, window_params = [{transform_indices = @transform_0, window_bounds = array<i64: 1, 8, 512>}, {pipeline_mode = #tpu.pipeline_mode<synchronous>, transform_indices = @transform_1, window_bounds = array<i64: 3, 512, 128>}, {pipeline_mode = #tpu.pipeline_mode<synchronous>, transform_indices = @transform_2, window_bounds = array<i64: 1, 128>}, {transform_indices = @transform_3, window_bounds = array<i64: 1, 8, 128>}, {transform_indices = @transform_4, window_bounds = array<i64: 1, 1, 128>}, {transform_indices = @transform_5, window_bounds = array<i64: 1, 1, 128>}]} {
    %cst = arith.constant 0.000000e+00 : bf16
    %0 = vector.broadcast %cst : bf16 to vector<1x1x512xbf16>
    %c0 = arith.constant 0 : index
    %c0_0 = arith.constant 0 : index
    %c0_1 = arith.constant 0 : index
    %1 = vector.load %arg7[%c0, %c0_0, %c0_1] : memref<1x10x512xbf16, #tpu.memory_space<vmem>>, vector<1x1x512xbf16>
    tpu.vector_store %arg7[%c0, %c0_0, %c0_1], %0 {strides = array<i32>} : memref<1x10x512xbf16, #tpu.memory_space<vmem>>, vector<1x1x512xbf16>,
    %c0_2 = arith.constant 0 : index
    %c9 = arith.constant 9 : index
    %c0_3 = arith.constant 0 : index
    %2 = vector.load %arg7[%c0_2, %c9, %c0_3] : memref<1x10x512xbf16, #tpu.memory_space<vmem>>, vector<1x1x512xbf16>
    tpu.vector_store %arg7[%c0_2, %c9, %c0_3], %0 {strides = array<i32>} : memref<1x10x512xbf16, #tpu.memory_space<vmem>>, vector<1x1x512xbf16>,
    %c0_4 = arith.constant 0 : index
    %c0_5 = arith.constant 0 : index
    %c0_6 = arith.constant 0 : index
    %3 = vector.load %arg1[%c0_4, %c0_5, %c0_6] : memref<1x8x512xbf16, #tpu.memory_space<vmem>>, vector<1x8x512xbf16>
    %c0_7 = arith.constant 0 : index
    %c1 = arith.constant 1 : index
    %c0_8 = arith.constant 0 : index
    %4 = vector.load %arg7[%c0_7, %c1, %c0_8] : memref<1x10x512xbf16, #tpu.memory_space<vmem>>, vector<1x8x512xbf16>
    tpu.vector_store %arg7[%c0_7, %c1, %c0_8], %3 {strides = array<i32>} : memref<1x10x512xbf16, #tpu.memory_space<vmem>>, vector<1x8x512xbf16>,
    %cst_9 = arith.constant 0.000000e+00 : f32
    %5 = vector.broadcast %cst_9 : f32 to vector<8x128xf32>
    %c0_10 = arith.constant 0 : index
    %c0_11 = arith.constant 0 : index
    %c0_12 = arith.constant 0 : index
    %6 = vector.load %arg7[%c0_10, %c0_11, %c0_12] : memref<1x10x512xbf16, #tpu.memory_space<vmem>>, vector<1x8x512xbf16>
    %7 = vector.shape_cast %6 : vector<1x8x512xbf16> to vector<8x512xbf16>
    %c0_13 = arith.constant 0 : index
    %c0_14 = arith.constant 0 : index
    %c0_15 = arith.constant 0 : index
    %8 = vector.load %arg2[%c0_13, %c0_14, %c0_15] : memref<3x512x128xbf16, #tpu.memory_space<vmem>>, vector<1x512x128xbf16>
    %9 = vector.shape_cast %8 : vector<1x512x128xbf16> to vector<512x128xbf16>
    %cst_16 = arith.constant dense<0.000000e+00> : vector<8x128xf32>
    %10 = tpu.matmul %7, %9, %cst_16 {dimension_numbers = #tpu.dot_dimension_numbers<[1], [0], [0], [1], [0, 0, 1, 1], [], []>} : vector<8x512xbf16>, vector<512x128xbf16>, vector<8x128xf32> -> vector<8x128xf32>
    %11 = arith.addf %5, %10 : vector<8x128xf32>
    %c0_17 = arith.constant 0 : index
    %c1_18 = arith.constant 1 : index
    %c0_19 = arith.constant 0 : index
    %12 = vector.load %arg7[%c0_17, %c1_18, %c0_19] : memref<1x10x512xbf16, #tpu.memory_space<vmem>>, vector<1x8x512xbf16>
    %13 = vector.shape_cast %12 : vector<1x8x512xbf16> to vector<8x512xbf16>
    %c1_20 = arith.constant 1 : index
    %c0_21 = arith.constant 0 : index
    %c0_22 = arith.constant 0 : index
    %14 = vector.load %arg2[%c1_20, %c0_21, %c0_22] : memref<3x512x128xbf16, #tpu.memory_space<vmem>>, vector<1x512x128xbf16>
    %15 = vector.shape_cast %14 : vector<1x512x128xbf16> to vector<512x128xbf16>
    %cst_23 = arith.constant dense<0.000000e+00> : vector<8x128xf32>
    %16 = tpu.matmul %13, %15, %cst_23 {dimension_numbers = #tpu.dot_dimension_numbers<[1], [0], [0], [1], [0, 0, 1, 1], [], []>} : vector<8x512xbf16>, vector<512x128xbf16>, vector<8x128xf32> -> vector<8x128xf32>
    %17 = arith.addf %11, %16 : vector<8x128xf32>
    %c0_24 = arith.constant 0 : index
    %c2 = arith.constant 2 : index
    %c0_25 = arith.constant 0 : index
    %18 = vector.load %arg7[%c0_24, %c2, %c0_25] : memref<1x10x512xbf16, #tpu.memory_space<vmem>>, vector<1x8x512xbf16>
    %19 = vector.shape_cast %18 : vector<1x8x512xbf16> to vector<8x512xbf16>
    %c2_26 = arith.constant 2 : index
    %c0_27 = arith.constant 0 : index
    %c0_28 = arith.constant 0 : index
    %20 = vector.load %arg2[%c2_26, %c0_27, %c0_28] : memref<3x512x128xbf16, #tpu.memory_space<vmem>>, vector<1x512x128xbf16>
    %21 = vector.shape_cast %20 : vector<1x512x128xbf16> to vector<512x128xbf16>
    %cst_29 = arith.constant dense<0.000000e+00> : vector<8x128xf32>
    %22 = tpu.matmul %19, %21, %cst_29 {dimension_numbers = #tpu.dot_dimension_numbers<[1], [0], [0], [1], [0, 0, 1, 1], [], []>} : vector<8x512xbf16>, vector<512x128xbf16>, vector<8x128xf32> -> vector<8x128xf32>
    %23 = arith.addf %17, %22 : vector<8x128xf32>
    %c0_30 = arith.constant 0 : index
    %c0_31 = arith.constant 0 : index
    %24 = vector.load %arg3[%c0_30, %c0_31] : memref<1x128xf32, #tpu.memory_space<vmem>>, vector<1x128xf32>
    %25 = vector.broadcast %24 : vector<1x128xf32> to vector<8x128xf32>
    %26 = arith.mulf %23, %25 : vector<8x128xf32>
    %cst_32 = arith.constant dense<0.000000e+00> : vector<128xf32>
    %27 = vector.multi_reduction <add>, %26, %cst_32 [0] : vector<8x128xf32> to vector<128xf32>
    %28 = vector.shape_cast %27 : vector<128xf32> to vector<1x128xf32>
    %29 = vector.shape_cast %28 : vector<1x128xf32> to vector<1x1x128xf32>
    %c0_33 = arith.constant 0 : index
    %c0_34 = arith.constant 0 : index
    %c0_35 = arith.constant 0 : index
    %30 = vector.load %arg5[%c0_33, %c0_34, %c0_35] : memref<1x1x128xf32, #tpu.memory_space<vmem>>, vector<1x1x128xf32>
    tpu.vector_store %arg5[%c0_33, %c0_34, %c0_35], %29 {strides = array<i32>} : memref<1x1x128xf32, #tpu.memory_space<vmem>>, vector<1x1x128xf32>,
    %31 = arith.mulf %26, %26 : vector<8x128xf32>
    %cst_36 = arith.constant dense<0.000000e+00> : vector<128xf32>
    %32 = vector.multi_reduction <add>, %31, %cst_36 [0] : vector<8x128xf32> to vector<128xf32>
    %33 = vector.shape_cast %32 : vector<128xf32> to vector<1x128xf32>
    %34 = vector.shape_cast %33 : vector<1x128xf32> to vector<1x1x128xf32>
    %c0_37 = arith.constant 0 : index
    %c0_38 = arith.constant 0 : index
    %c0_39 = arith.constant 0 : index
    %35 = vector.load %arg6[%c0_37, %c0_38, %c0_39] : memref<1x1x128xf32, #tpu.memory_space<vmem>>, vector<1x1x128xf32>
    tpu.vector_store %arg6[%c0_37, %c0_38, %c0_39], %34 {strides = array<i32>} : memref<1x1x128xf32, #tpu.memory_space<vmem>>, vector<1x1x128xf32>,
    %36 = vector.shape_cast %26 : vector<8x128xf32> to vector<1x8x128xf32>
    %c0_40 = arith.constant 0 : index
    %c0_41 = arith.constant 0 : index
    %c0_42 = arith.constant 0 : index
    %37 = vector.load %arg4[%c0_40, %c0_41, %c0_42] : memref<1x8x128xf32, #tpu.memory_space<vmem>>, vector<1x8x128xf32>
    tpu.vector_store %arg4[%c0_40, %c0_41, %c0_42], %36 {strides = array<i32>} : memref<1x8x128xf32, #tpu.memory_space<vmem>>, vector<1x8x128xf32>,
    return
  }
  func.func @transform_0(%arg0: i32) -> (i32, i32, i32) {
    %c0_i32 = arith.constant 0 : i32
    %c0_i32_0 = arith.constant 0 : i32
    %c0_i32_1 = arith.constant 0 : i32
    return %arg0, %c0_i32, %c0_i32_0 : i32, i32, i32
  }
  func.func @transform_1(%arg0: i32) -> (i32, i32, i32) {
    %c0_i32 = arith.constant 0 : i32
    %c0_i32_0 = arith.constant 0 : i32
    %c0_i32_1 = arith.constant 0 : i32
    %c0_i32_2 = arith.constant 0 : i32
    return %c0_i32, %c0_i32_0, %c0_i32_1 : i32, i32, i32
  }
  func.func @transform_2(%arg0: i32) -> (i32, i32) {
    %c0_i32 = arith.constant 0 : i32
    %c0_i32_0 = arith.constant 0 : i32
    %c0_i32_1 = arith.constant 0 : i32
    return %c0_i32, %c0_i32_0 : i32, i32
  }
  func.func @transform_3(%arg0: i32) -> (i32, i32, i32) {
    %c0_i32 = arith.constant 0 : i32
    %c0_i32_0 = arith.constant 0 : i32
    %c0_i32_1 = arith.constant 0 : i32
    return %arg0, %c0_i32, %c0_i32_0 : i32, i32, i32
  }
  func.func @transform_4(%arg0: i32) -> (i32, i32, i32) {
    %c0_i32 = arith.constant 0 : i32
    %c0_i32_0 = arith.constant 0 : i32
    %c0_i32_1 = arith.constant 0 : i32
    return %arg0, %c0_i32, %c0_i32_0 : i32, i32, i32
  }
  func.func @transform_5(%arg0: i32) -> (i32, i32, i32) {
    %c0_i32 = arith.constant 0 : i32
    %c0_i32_0 = arith.constant 0 : i32
    %c0_i32_1 = arith.constant 0 : i32
    return %arg0, %c0_i32, %c0_i32_0 : i32, i32, i32
  }
}

module attributes {stable_mosaic.version = 11 : i64} {
  func.func @_ghost_combine_kernel(%arg0: i32, %arg1: memref<1x8x128xf32, #tpu.memory_space<vmem>>, %arg2: memref<1x8x512xbf16, #tpu.memory_space<vmem>>, %arg3: memref<1x128xf32, #tpu.memory_space<vmem>>, %arg4: memref<1x128xf32, #tpu.memory_space<vmem>>, %arg5: memref<1x512xf32, #tpu.memory_space<vmem>>, %arg6: memref<1x8x512xbf16, #tpu.memory_space<vmem>>) attributes {dimension_semantics = [#tpu.dimension_semantics<parallel>], iteration_bounds = array<i64: 2>, scalar_prefetch = 0 : i64, scratch_operands = 0 : i64, tpu.core_type = #tpu.core_type<tc>, window_params = [{transform_indices = @transform_0, window_bounds = array<i64: 1, 8, 128>}, {transform_indices = @transform_1, window_bounds = array<i64: 1, 8, 512>}, {pipeline_mode = #tpu.pipeline_mode<synchronous>, transform_indices = @transform_2, window_bounds = array<i64: 1, 128>}, {pipeline_mode = #tpu.pipeline_mode<synchronous>, transform_indices = @transform_3, window_bounds = array<i64: 1, 128>}, {pipeline_mode = #tpu.pipeline_mode<synchronous>, transform_indices = @transform_4, window_bounds = array<i64: 1, 512>}, {transform_indices = @transform_5, window_bounds = array<i64: 1, 8, 512>}]} {
    %c0 = arith.constant 0 : index
    %c0_0 = arith.constant 0 : index
    %c0_1 = arith.constant 0 : index
    %0 = vector.load %arg1[%c0, %c0_0, %c0_1] : memref<1x8x128xf32, #tpu.memory_space<vmem>>, vector<1x8x128xf32>
    %c0_2 = arith.constant 0 : index
    %c0_3 = arith.constant 0 : index
    %1 = vector.load %arg3[%c0_2, %c0_3] : memref<1x128xf32, #tpu.memory_space<vmem>>, vector<1x128xf32>
    %2 = vector.shape_cast %1 : vector<1x128xf32> to vector<1x1x128xf32>
    %3 = vector.broadcast %2 : vector<1x1x128xf32> to vector<1x8x128xf32>
    %4 = arith.mulf %0, %3 : vector<1x8x128xf32>
    %c0_4 = arith.constant 0 : index
    %c0_5 = arith.constant 0 : index
    %5 = vector.load %arg4[%c0_4, %c0_5] : memref<1x128xf32, #tpu.memory_space<vmem>>, vector<1x128xf32>
    %6 = vector.shape_cast %5 : vector<1x128xf32> to vector<1x1x128xf32>
    %7 = vector.broadcast %6 : vector<1x1x128xf32> to vector<1x8x128xf32>
    %8 = arith.addf %4, %7 : vector<1x8x128xf32>
    %9 = tpu.concatenate %8, %8, %8, %8 in 2 : vector<1x8x128xf32>, vector<1x8x128xf32>, vector<1x8x128xf32>, vector<1x8x128xf32> -> vector<1x8x512xf32>
    %c0_6 = arith.constant 0 : index
    %c0_7 = arith.constant 0 : index
    %10 = vector.load %arg5[%c0_6, %c0_7] : memref<1x512xf32, #tpu.memory_space<vmem>>, vector<1x512xf32>
    %11 = vector.shape_cast %10 : vector<1x512xf32> to vector<1x1x512xf32>
    %12 = vector.broadcast %11 : vector<1x1x512xf32> to vector<1x8x512xf32>
    %13 = arith.addf %9, %12 : vector<1x8x512xf32>
    %cst = arith.constant 0.000000e+00 : f32
    %14 = vector.broadcast %cst : f32 to vector<1x8x512xf32>
    %15 = arith.cmpf oge, %13, %14 : vector<1x8x512xf32>
    %cst_8 = arith.constant 1.000000e+00 : f32
    %cst_9 = arith.constant -1.000000e+00 : f32
    %16 = vector.broadcast %cst_8 : f32 to vector<1x8x512xf32>
    %17 = vector.broadcast %cst_9 : f32 to vector<1x8x512xf32>
    %18 = arith.select %15, %16, %17 : vector<1x8x512xi1>, vector<1x8x512xf32>
    %c0_10 = arith.constant 0 : index
    %c0_11 = arith.constant 0 : index
    %c0_12 = arith.constant 0 : index
    %19 = vector.load %arg2[%c0_10, %c0_11, %c0_12] : memref<1x8x512xbf16, #tpu.memory_space<vmem>>, vector<1x8x512xbf16>
    %20 = arith.extf %19 : vector<1x8x512xbf16> to vector<1x8x512xf32>
    %21 = arith.mulf %18, %20 : vector<1x8x512xf32>
    %22 = arith.truncf %21 : vector<1x8x512xf32> to vector<1x8x512xbf16>
    %c0_13 = arith.constant 0 : index
    %c0_14 = arith.constant 0 : index
    %c0_15 = arith.constant 0 : index
    %23 = vector.load %arg6[%c0_13, %c0_14, %c0_15] : memref<1x8x512xbf16, #tpu.memory_space<vmem>>, vector<1x8x512xbf16>
    tpu.vector_store %arg6[%c0_13, %c0_14, %c0_15], %22 {strides = array<i32>} : memref<1x8x512xbf16, #tpu.memory_space<vmem>>, vector<1x8x512xbf16>,
    return
  }
  func.func @transform_0(%arg0: i32) -> (i32, i32, i32) {
    %c0_i32 = arith.constant 0 : i32
    %c0_i32_0 = arith.constant 0 : i32
    %c0_i32_1 = arith.constant 0 : i32
    return %arg0, %c0_i32, %c0_i32_0 : i32, i32, i32
  }
  func.func @transform_1(%arg0: i32) -> (i32, i32, i32) {
    %c0_i32 = arith.constant 0 : i32
    %c0_i32_0 = arith.constant 0 : i32
    %c0_i32_1 = arith.constant 0 : i32
    return %arg0, %c0_i32, %c0_i32_0 : i32, i32, i32
  }
  func.func @transform_2(%arg0: i32) -> (i32, i32) {
    %c0_i32 = arith.constant 0 : i32
    %c0_i32_0 = arith.constant 0 : i32
    %c0_i32_1 = arith.constant 0 : i32
    return %c0_i32, %c0_i32_0 : i32, i32
  }
  func.func @transform_3(%arg0: i32) -> (i32, i32) {
    %c0_i32 = arith.constant 0 : i32
    %c0_i32_0 = arith.constant 0 : i32
    %c0_i32_1 = arith.constant 0 : i32
    return %c0_i32, %c0_i32_0 : i32, i32
  }
  func.func @transform_4(%arg0: i32) -> (i32, i32) {
    %c0_i32 = arith.constant 0 : i32
    %c0_i32_0 = arith.constant 0 : i32
    %c0_i32_1 = arith.constant 0 : i32
    return %c0_i32, %c0_i32_0 : i32, i32
  }
  func.func @transform_5(%arg0: i32) -> (i32, i32, i32) {
    %c0_i32 = arith.constant 0 : i32
    %c0_i32_0 = arith.constant 0 : i32
    %c0_i32_1 = arith.constant 0 : i32
    return %arg0, %c0_i32, %c0_i32_0 : i32, i32, i32
  }
}

module attributes {stable_mosaic.version = 11 : i64} {
  func.func @_ghost_combine_kernel(%arg0: i32, %arg1: memref<1x8x128xf32, #tpu.memory_space<vmem>>, %arg2: memref<1x8x512xbf16, #tpu.memory_space<vmem>>, %arg3: memref<1x128xf32, #tpu.memory_space<vmem>>, %arg4: memref<1x128xf32, #tpu.memory_space<vmem>>, %arg5: memref<1x512xf32, #tpu.memory_space<vmem>>, %arg6: memref<1x8x512xbf16, #tpu.memory_space<vmem>>) attributes {dimension_semantics = [#tpu.dimension_semantics<parallel>], iteration_bounds = array<i64: 2>, scalar_prefetch = 0 : i64, scratch_operands = 0 : i64, tpu.core_type = #tpu.core_type<tc>, window_params = [{transform_indices = @transform_0, window_bounds = array<i64: 1, 8, 128>}, {transform_indices = @transform_1, window_bounds = array<i64: 1, 8, 512>}, {pipeline_mode = #tpu.pipeline_mode<synchronous>, transform_indices = @transform_2, window_bounds = array<i64: 1, 128>}, {pipeline_mode = #tpu.pipeline_mode<synchronous>, transform_indices = @transform_3, window_bounds = array<i64: 1, 128>}, {pipeline_mode = #tpu.pipeline_mode<synchronous>, transform_indices = @transform_4, window_bounds = array<i64: 1, 512>}, {transform_indices = @transform_5, window_bounds = array<i64: 1, 8, 512>}]} {
    %c0 = arith.constant 0 : index
    %c0_0 = arith.constant 0 : index
    %c0_1 = arith.constant 0 : index
    %0 = vector.load %arg1[%c0, %c0_0, %c0_1] : memref<1x8x128xf32, #tpu.memory_space<vmem>>, vector<1x8x128xf32>
    %c0_2 = arith.constant 0 : index
    %c0_3 = arith.constant 0 : index
    %1 = vector.load %arg3[%c0_2, %c0_3] : memref<1x128xf32, #tpu.memory_space<vmem>>, vector<1x128xf32>
    %2 = vector.shape_cast %1 : vector<1x128xf32> to vector<1x1x128xf32>
    %3 = vector.broadcast %2 : vector<1x1x128xf32> to vector<1x8x128xf32>
    %4 = arith.mulf %0, %3 : vector<1x8x128xf32>
    %c0_4 = arith.constant 0 : index
    %c0_5 = arith.constant 0 : index
    %5 = vector.load %arg4[%c0_4, %c0_5] : memref<1x128xf32, #tpu.memory_space<vmem>>, vector<1x128xf32>
    %6 = vector.shape_cast %5 : vector<1x128xf32> to vector<1x1x128xf32>
    %7 = vector.broadcast %6 : vector<1x1x128xf32> to vector<1x8x128xf32>
    %8 = arith.addf %4, %7 : vector<1x8x128xf32>
    %9 = tpu.concatenate %8, %8, %8, %8 in 2 : vector<1x8x128xf32>, vector<1x8x128xf32>, vector<1x8x128xf32>, vector<1x8x128xf32> -> vector<1x8x512xf32>
    %c0_6 = arith.constant 0 : index
    %c0_7 = arith.constant 0 : index
    %10 = vector.load %arg5[%c0_6, %c0_7] : memref<1x512xf32, #tpu.memory_space<vmem>>, vector<1x512xf32>
    %11 = vector.shape_cast %10 : vector<1x512xf32> to vector<1x1x512xf32>
    %12 = vector.broadcast %11 : vector<1x1x512xf32> to vector<1x8x512xf32>
    %13 = arith.addf %9, %12 : vector<1x8x512xf32>
    %cst = arith.constant 0.000000e+00 : f32
    %14 = vector.broadcast %cst : f32 to vector<1x8x512xf32>
    %15 = arith.cmpf oge, %13, %14 : vector<1x8x512xf32>
    %cst_8 = arith.constant 1.000000e+00 : f32
    %cst_9 = arith.constant -1.000000e+00 : f32
    %16 = vector.broadcast %cst_8 : f32 to vector<1x8x512xf32>
    %17 = vector.broadcast %cst_9 : f32 to vector<1x8x512xf32>
    %18 = arith.select %15, %16, %17 : vector<1x8x512xi1>, vector<1x8x512xf32>
    %c0_10 = arith.constant 0 : index
    %c0_11 = arith.constant 0 : index
    %c0_12 = arith.constant 0 : index
    %19 = vector.load %arg2[%c0_10, %c0_11, %c0_12] : memref<1x8x512xbf16, #tpu.memory_space<vmem>>, vector<1x8x512xbf16>
    %20 = arith.extf %19 : vector<1x8x512xbf16> to vector<1x8x512xf32>
    %cst_13 = arith.constant 1.000000e+00 : f32
    %21 = vector.broadcast %cst_13 : f32 to vector<1x8x512xf32>
    %22 = arith.addf %18, %21 : vector<1x8x512xf32>
    %cst_14 = arith.constant 5.000000e-01 : f32
    %23 = vector.broadcast %cst_14 : f32 to vector<1x8x512xf32>
    %24 = arith.mulf %23, %22 : vector<1x8x512xf32>
    %cst_15 = arith.constant 1.000000e+00 : f32
    %25 = vector.broadcast %cst_15 : f32 to vector<1x8x512xf32>
    %26 = arith.addf %20, %25 : vector<1x8x512xf32>
    %cst_16 = arith.constant 5.000000e-01 : f32
    %27 = vector.broadcast %cst_16 : f32 to vector<1x8x512xf32>
    %28 = arith.mulf %27, %26 : vector<1x8x512xf32>
    %29 = arith.addf %24, %28 : vector<1x8x512xf32>
    %cst_17 = arith.constant 0.000000e+00 : f32
    %cst_18 = arith.constant 1.000000e+00 : f32
    %30 = vector.broadcast %cst_17 : f32 to vector<1x8x512xf32>
    %31 = arith.maximumf %30, %29 : vector<1x8x512xf32>
    %32 = vector.broadcast %cst_18 : f32 to vector<1x8x512xf32>
    %33 = arith.minimumf %32, %31 : vector<1x8x512xf32>
    %cst_19 = arith.constant 2.000000e+00 : f32
    %34 = vector.broadcast %cst_19 : f32 to vector<1x8x512xf32>
    %35 = arith.mulf %33, %34 : vector<1x8x512xf32>
    %cst_20 = arith.constant 1.000000e+00 : f32
    %36 = vector.broadcast %cst_20 : f32 to vector<1x8x512xf32>
    %37 = arith.subf %35, %36 : vector<1x8x512xf32>
    %38 = arith.truncf %37 : vector<1x8x512xf32> to vector<1x8x512xbf16>
    %c0_21 = arith.constant 0 : index
    %c0_22 = arith.constant 0 : index
    %c0_23 = arith.constant 0 : index
    %39 = vector.load %arg6[%c0_21, %c0_22, %c0_23] : memref<1x8x512xbf16, #tpu.memory_space<vmem>>, vector<1x8x512xbf16>
    tpu.vector_store %arg6[%c0_21, %c0_22, %c0_23], %38 {strides = array<i32>} : memref<1x8x512xbf16, #tpu.memory_space<vmem>>, vector<1x8x512xbf16>,
    return
  }
  func.func @transform_0(%arg0: i32) -> (i32, i32, i32) {
    %c0_i32 = arith.constant 0 : i32
    %c0_i32_0 = arith.constant 0 : i32
    %c0_i32_1 = arith.constant 0 : i32
    return %arg0, %c0_i32, %c0_i32_0 : i32, i32, i32
  }
  func.func @transform_1(%arg0: i32) -> (i32, i32, i32) {
    %c0_i32 = arith.constant 0 : i32
    %c0_i32_0 = arith.constant 0 : i32
    %c0_i32_1 = arith.constant 0 : i32
    return %arg0, %c0_i32, %c0_i32_0 : i32, i32, i32
  }
  func.func @transform_2(%arg0: i32) -> (i32, i32) {
    %c0_i32 = arith.constant 0 : i32
    %c0_i32_0 = arith.constant 0 : i32
    %c0_i32_1 = arith.constant 0 : i32
    return %c0_i32, %c0_i32_0 : i32, i32
  }
  func.func @transform_3(%arg0: i32) -> (i32, i32) {
    %c0_i32 = arith.constant 0 : i32
    %c0_i32_0 = arith.constant 0 : i32
    %c0_i32_1 = arith.constant 0 : i32
    return %c0_i32, %c0_i32_0 : i32, i32
  }
  func.func @transform_4(%arg0: i32) -> (i32, i32) {
    %c0_i32 = arith.constant 0 : i32
    %c0_i32_0 = arith.constant 0 : i32
    %c0_i32_1 = arith.constant 0 : i32
    return %c0_i32, %c0_i32_0 : i32, i32
  }
  func.func @transform_5(%arg0: i32) -> (i32, i32, i32) {
    %c0_i32 = arith.constant 0 : i32
    %c0_i32_0 = arith.constant 0 : i32
    %c0_i32_1 = arith.constant 0 : i32
    return %arg0, %c0_i32, %c0_i32_0 : i32, i32, i32
  }
}

</mosaic_0001>

<bundles_post_ra>
// kernel: tile.41
= control target key start
LH: loop header
LB: loop body
LE: loop exit
PB: predicated region body
PF: predicated region fallthrough
CT: control target
= control target key end

     0   :  { %s22_s0 = inlined_call_operand.vmem [shape: f32[16], index: 0, kind: input, shape index: {}]   ;;  %s23_s1 = inlined_call_operand.vmem [shape: f32[8,16], index: 1, kind: output, shape index: {}]  }
   0x1   :  { %v4_v0 = vld [vmem:[%s22_s0] ss:$0 sm:$0xff] }
   0x2   :  { %5 = vst [vmem:[%s23_s1] sm:$0xff] %v4_v0 }

// kernel: tile.42
= control target key start
LH: loop header
LB: loop body
LE: loop exit
PB: predicated region body
PF: predicated region fallthrough
CT: control target
= control target key end

     0   :  { %s67_s10 = smov 112   ;;  %s68_s11 = smov 80   ;;  %vm3_vm0 = vcmask 130048   ;;  %vm9_vm1 = vcmask 1048448   ;;  %vm15_vm2 = vcmask 917248   ;;  %vm21_vm3 = vcmask 786048   ;;  %s111_s0 = inlined_call_operand.vmem [shape: f32[8,16], index: 0, kind: input, shape index: {}]   ;;  %s112_s1 = inlined_call_operand.vmem [shape: f32[1,128], index: 1, kind: output, shape index: {}]  }
   0x1   :  { %v53_v0 = vld [vmem:[%s111_s0 + $0x7] sm:$0x1]   ;;  %v55_v1 = vld [vmem:[%s111_s0 + $0x5] sm:$0x1]   ;;  %v57_v2 = vld [vmem:[%s111_s0 + $0x3] sm:$0x1]  }
   0x2   :  { %7 = vrot.lane.b32.xlu0 %v53_v0, %s67_s10  ;;  %19 = vrot.lane.b32.xlu1 %v55_v1, %s68_s11  ;;  %s69_s14 = smov 48   ;;  %v54_v3 = vld [vmem:[%s111_s0 + $0x6] sm:$0x1]   ;;  %v56_v4 = vld [vmem:[%s111_s0 + $0x4] sm:$0x1]   ;;  %s70_s21 = smov 96  }
   0x3   :  { %31 = vrot.lane.b32.xlu2 %v57_v2, %s69_s14  ;;  %v58_v5 = vld [vmem:[%s111_s0 + $0x2] sm:$0x1]   ;;  %s71_s22 = smov 64   ;;  %s72_s23 = smov 32   ;;  %v59_v6 = vld [vmem:[%s111_s0 + $0x1] sm:$0x1]  }
   0x4   :  { %s73_s26 = smov 16   ;;  %v2_v7 = vld [vmem:[%s111_s0] sm:$0x1]   ;;  %vm27_vm4 = vcmask 654848   ;;  %vm33_vm5 = vcmask 523648   ;;  %vm39_vm6 = vcmask 392448  }
   0x5   :  { %4 = vst.msk [vmem:[#allocation0] sm:$0x1] %vm3_vm0, %v2_v7   ;;  %vm45_vm7 = vcmask 261248  }
   0xa   :  { %13 = vrot.lane.b32.xlu0 %v54_v3, %s70_s21  ;;  %25 = vrot.lane.b32.xlu1 %v56_v4, %s71_s22 }
   0xb   :  { %37 = vrot.lane.b32.xlu2 %v58_v5, %s72_s23 }
  0x12   :  { %43 = vrot.lane.b32.xlu0 %v59_v6, %s73_s26 }
  0x5d   :  { %v32_v8 = vpop.permute.xlu2 %31  }
  0x65   :  { %v38_v9 = vpop.permute.xlu2 %37  }
  0x74   :  { %v8_v10 = vpop.permute.xlu0 %7   ;;  %v20_v11 = vpop.permute.xlu1 %19  }
  0x75   :  { %10 = vst.msk [vmem:[#allocation0] sm:$0x1] %vm9_vm1, %v8_v10  }
  0x7c   :  { %v14_v12 = vpop.permute.xlu0 %13   ;;  %v26_v13 = vpop.permute.xlu1 %25  }
  0x7d   :  { %16 = vst.msk [vmem:[#allocation0] sm:$0x1] %vm15_vm2, %v14_v12  }
  0x7e   :  { %22 = vst.msk [vmem:[#allocation0] sm:$0x1] %vm21_vm3, %v20_v11  }
  0x7f   :  { %28 = vst.msk [vmem:[#allocation0] sm:$0x1] %vm27_vm4, %v26_v13  }
  0x80   :  { %34 = vst.msk [vmem:[#allocation0] sm:$0x1] %vm33_vm5, %v32_v8  }
  0x81   :  { %40 = vst.msk [vmem:[#allocation0] sm:$0x1] %vm39_vm6, %v38_v9  }
  0x84   :  { %v44_v14 = vpop.permute.xlu0 %43  }
  0x85   :  { %46 = vst.msk [vmem:[#allocation0] sm:$0x1] %vm45_vm7, %v44_v14  }
  0x8c   :  { %v49_v15 = vld [vmem:[#allocation0] sm:$0x1] }
  0x8d   :  { %52 = vst [vmem:[%s112_s1] sm:$0x1] %v49_v15 }

// kernel: basic_block_forward.4
= control target key start
LH: loop header
LB: loop body
LE: loop exit
PB: predicated region body
PF: predicated region fallthrough
CT: control target
= control target key end

     0   :  { %s2101_s18 = smov 0   ;;  %s2525_s0 = inlined_call_operand.vmem [shape: bf16[2,8,512], index: 0, kind: input, shape index: {}]   ;;  %s2526_s1 = inlined_call_operand.vmem [shape: bf16[3,512,128], index: 1, kind: input, shape index: {}]   ;;  %s2527_s2 = inlined_call_operand.vmem [shape: f32[1,128], index: 2, kind: input, shape index: {}]   ;;  %s2528_s3 = inlined_call_operand.vmem [shape: f32[2,8,128], index: 3, kind: output, shape index: {0}]   ;;  %s2529_s4 = inlined_call_operand.vmem [shape: f32[2,1,128], index: 4, kind: output, shape index: {1}]   ;;  %s2530_s5 = inlined_call_operand.vmem [shape: f32[2,1,128], index: 5, kind: output, shape index: {2}]  }
   0x1 LB: > { %s1435_s19 = sadd.s32 4294967295, %s2069_s18   ;;  %p1439_p0 = scmp.ge.s32.totalorder %s2069_s18, 1  ;;  %s2069_s18 = sphi %s2101_s18, %s16_s18  }
   0x2   : > { %p192_p1 = scmp.lt.s32.totalorder %s2069_s18, 3 }
   0x4   : > { %p193_p2 = pnand %p1439_p0, %p192_p1 }
   0x5   : > { %p225_p3 = scmp.lt.s32.totalorder (!%p193_p2), %s1435_s19, 1 }
   0x6   : > { %196 = sbr.rel (%p193_p2) target bundleno = 264 (0x108), region = 32 }
   0xb   : > { %v1997_v0 = vld [vmem:[%s2526_s1 + $0x138] sm:$0xff]  ;;  %v1996_v4 = vld [vmem:[%s2526_s1 + $0x130] sm:$0xff]  ;;  %v1995_v8 = vld [vmem:[%s2526_s1 + $0x128] sm:$0xff]  ;;  %s2542_s19 = smov (!%p225_p3, %s1435_s19), 1  ;;  %vm242_vm0 = vsmask.f32 256 }
   0xc   : > { %v2005_v1 = vld [vmem:[%s2526_s1 + $0x178] sm:$0xff]  ;;  %677 = vmatpush.bf16.msra.mxu0 %v1997_v0  ;;  %v2004_v5 = vld [vmem:[%s2526_s1 + $0x170] sm:$0xff]  ;;  %v2003_v9 = vld [vmem:[%s2526_s1 + $0x168] sm:$0xff]  ;;  %s1957_s29 = sshll.u32 %s2542_s19, 4  ;;  %vm245_vm1 = vsmask.f32 4352  ;;  %s239_s20 = scalar_lea.vmem %s2530_s5, %s2542_s19 }
   0xd   : > { %v2013_v2 = vld [vmem:[%s2526_s1 + $0x1b8] sm:$0xff]  ;;  %690 = vmatpush.bf16.msra.mxu1 %v2005_v1  ;;  %v2012_v6 = vld [vmem:[%s2526_s1 + $0x1b0] sm:$0xff]  ;;  %v2011_v10 = vld [vmem:[%s2526_s1 + $0x1a8] sm:$0xff]  ;;  %s2175_s15 = scalar_lea.vmem %s2525_s0, %s1957_s29  ;;  %vm241_vm2 = vcmask 1040384   ;;  %vm244_vm4 = vcmask 1044484   ;;  %vm287_vm10 = vcmask 1043456  }
   0xe   : > { %v2021_v3 = vld [vmem:[%s2526_s1 + $0x1f8] sm:$0xff]  ;;  %703 = vmatpush.bf16.msra.mxu2 %v2013_v2  ;;  %v2020_v7 = vld [vmem:[%s2526_s1 + $0x1f0] sm:$0xff]  ;;  %v2019_v11 = vld [vmem:[%s2526_s1 + $0x1e8] sm:$0xff]  ;;  %vm254_vm5 = vsmask.f32 7938  ;;  %vm289_vm11 = vcmask 1047556  }
   0xf   : > { %716 = vmatpush.bf16.msra.mxu3 %v2021_v3  ;;  %v1994_v12 = vld [vmem:[%s2526_s1 + $0x120] sm:$0xff]  ;;  %v1993_v16 = vld [vmem:[%s2526_s1 + $0x118] sm:$0xff]  ;;  %v1992_v20 = vld [vmem:[%s2526_s1 + $0x110] sm:$0xff]  ;;  %vm256_vm7 = vsmask.f32 7954  ;;  %s1442_s7 = sshll.u32 %s2542_s19, 3 }
  0x10   : > { %678 = vmatpush.bf16.msra.mxu0 %v1996_v4  ;;  %v2002_v13 = vld [vmem:[%s2526_s1 + $0x160] sm:$0xff]  ;;  %v2001_v17 = vld [vmem:[%s2526_s1 + $0x158] sm:$0xff]  ;;  %vm243_vm3 = vmand %vm241_vm2, %vm242_vm0  ;;  %s233_s12 = scalar_lea.vmem %s2528_s3, %s1442_s7 }
  0x11   : > { %691 = vmatpush.bf16.msra.mxu1 %v2004_v5  ;;  %v2010_v14 = vld [vmem:[%s2526_s1 + $0x1a0] sm:$0xff]  ;;  %v2009_v18 = vld [vmem:[%s2526_s1 + $0x198] sm:$0xff]  ;;  %v2000_v22 = vld [vmem:[%s2526_s1 + $0x150] sm:$0xff] }
  0x12   : > { %704 = vmatpush.bf16.msra.mxu2 %v2012_v6  ;;  %v2018_v15 = vld [vmem:[%s2526_s1 + $0x1e0] sm:$0xff]  ;;  %v2017_v19 = vld [vmem:[%s2526_s1 + $0x1d8] sm:$0xff]  ;;  %vm246_vm6 = vmand %vm244_vm4, %vm245_vm1 }
  0x13   : > { %717 = vmatpush.bf16.msra.mxu3 %v2020_v7  ;;  %v251_v21 = vld [vmem:[#allocation2] sm:$0x11]  ;;  %v266_v23 = vld [vmem:[%s2175_s15 + $0x8] sm:$0xff]  ;;  %v2008_v24 = vld [vmem:[%s2526_s1 + $0x190] sm:$0xff] }
  0x14   : > { %679 = vmatpush.bf16.msra.mxu0 %v1995_v8  ;;  %v2016_v25 = vld [vmem:[%s2526_s1 + $0x1d0] sm:$0xff]  ;;  %vm2192_vm8 = vmor %vm246_vm6, %vm243_vm3  ;;  %v275_v27 = vshrl.u32 %v266_v23, 16  ;;  %v1991_v28 = vld [vmem:[%s2526_s1 + $0x108] sm:$0xff]  ;;  %v278_v35 = vshll.u32 %v266_v23, 16 }
  0x15   : > { %692 = vmatpush.bf16.msra.mxu1 %v2003_v9  ;;  %v1999_v29 = vld [vmem:[%s2526_s1 + $0x148] sm:$0xff]  ;;  %v252_v30 = vsel %vm2192_vm8, 0, %v251_v21  ;;  %vm2206_vm9 = vmand %vm241_vm2, %vm254_vm5  ;;  %v248_v36 = vld [vmem:[#allocation2 + $0x10] sm:$0x11] }
  0x16   : > { %705 = vmatpush.bf16.msra.mxu2 %v2011_v10  ;;  %v262_v32 = vld [vmem:[#allocation2 + $0x8] sm:$0x11]  ;;  %253 = vst [vmem:[#allocation2] sm:$0x11] %v252_v30  ;;  %vm2215_vm12 = vmand %vm244_vm4, %vm256_vm7  ;;  %v265_v37 = vld [vmem:[%s2175_s15] sm:$0xff]  ;;  %v249_v39 = vsel %vm2192_vm8, 0, %v248_v36  ;;  %s236_s15 = scalar_lea.vmem %s2529_s4, %s2542_s19 }
  0x17   : > { %718 = vmatpush.bf16.msra.mxu3 %v2019_v11  ;;  %v2007_v33 = vld [vmem:[%s2526_s1 + $0x188] sm:$0xff]  ;;  %vm258_vm13 = vmor %vm2215_vm12, %vm2206_vm9  ;;  %v259_v40 = vld [vmem:[#allocation2 + $0x18] sm:$0x11]  ;;  %v268_v41 = vshrl.u32 %v265_v37, 16  ;;  %v277_v43 = vrot.slane %v275_v27, 7  ;;  %v271_v46 = vshll.u32 %v265_v37, 16 }
  0x18   : > { %680 = vmatpush.bf16.msra.mxu0 %v1994_v12  ;;  %v2015_v38 = vld [vmem:[%s2526_s1 + $0x1c8] sm:$0xff]  ;;  %v263_v42 = vsel %vm258_vm13, 0, %v262_v32  ;;  %vm2231_vm14 = vmand %vm287_vm10, %vm254_vm5  ;;  %250 = vst [vmem:[#allocation2 + $0x10] sm:$0x11] %v249_v39  ;;  %v260_v45 = vsel %vm258_vm13, 0, %v259_v40  ;;  %v1990_v50 = vld [vmem:[%s2526_s1 + $0x100] sm:$0xff] }
  0x19   : > { %693 = vmatpush.bf16.msra.mxu1 %v2002_v13  ;;  %264 = vst [vmem:[#allocation2 + $0x8] sm:$0x11] %v263_v42  ;;  %vm2237_vm15 = vmand %vm289_vm11, %vm256_vm7  ;;  %v280_v48 = vor.u32 %v278_v35, %v277_v43  ;;  %v270_v49 = vrot.slane %v268_v41, 7  ;;  %v1998_v51 = vld [vmem:[%s2526_s1 + $0x140] sm:$0xff]  ;;  %v1965_v55 = vld [vmem:[%s2526_s1 + $0x38] sm:$0xff]  ;;  %v282_v57 = vrot.slane %v277_v43, 4 }
  0x1a   : > { %706 = vmatpush.bf16.msra.mxu2 %v2010_v14  ;;  %261 = vst [vmem:[#allocation2 + $0x18] sm:$0x11] %v260_v45  ;;  %vm291_vm0 = vmor %vm2237_vm15, %vm2231_vm14  ;;  %v2006_v52 = vld [vmem:[%s2526_s1 + $0x180] sm:$0xff]  ;;  %v1973_v56 = vld [vmem:[%s2526_s1 + $0x78] sm:$0xff] }
  0x1b   : > { %719 = vmatpush.bf16.msra.mxu3 %v2018_v15  ;;  %v2014_v53 = vld [vmem:[%s2526_s1 + $0x1c0] sm:$0xff]  ;;  %v273_v54 = vor.u32 %v271_v46, %v270_v49  ;;  %v1981_v59 = vld [vmem:[%s2526_s1 + $0xb8] sm:$0xff]  ;;  %v281_v62 = vrot.slane %v270_v49, 4  ;;  %v1964_v2 = vld [vmem:[%s2526_s1 + $0x30] sm:$0xff] }
  0x1c   : > { %681 = vmatpush.bf16.msra.mxu0 %v1993_v16  ;;  %v1989_v60 = vld [vmem:[%s2526_s1 + $0xf8] sm:$0xff]  ;;  %v1972_v3 = vld [vmem:[%s2526_s1 + $0x70] sm:$0xff]  ;;  %v1963_v9 = vld [vmem:[%s2526_s1 + $0x28] sm:$0xff] }
  0x1d   : > { %694 = vmatpush.bf16.msra.mxu1 %v2001_v17  ;;  %v295_v58 = vld [vmem:[#allocation2] sm:$0xff]  ;;  %v1980_v6 = vld [vmem:[%s2526_s1 + $0xb0] sm:$0xff]  ;;  %v1971_v10 = vld [vmem:[%s2526_s1 + $0x68] sm:$0xff] }
  0x1e   : > { %707 = vmatpush.bf16.msra.mxu2 %v2009_v18  ;;  %v296_v61 = vsel %vm291_vm0, %v280_v48, %v295_v58  ;;  %v1988_v7 = vld [vmem:[%s2526_s1 + $0xf0] sm:$0xff]  ;;  %v1979_v11 = vld [vmem:[%s2526_s1 + $0xa8] sm:$0xff]  ;;  %v1962_v15 = vld [vmem:[%s2526_s1 + $0x20] sm:$0xff] }
  0x1f   : > { %720 = vmatpush.bf16.msra.mxu3 %v2017_v19  ;;  %297 = vst [vmem:[#allocation2] sm:$0xff] %v296_v61  ;;  %v292_v63 = vld [vmem:[#allocation2 + $0x10] sm:$0xff]  ;;  %v1987_v12 = vld [vmem:[%s2526_s1 + $0xe8] sm:$0xff]  ;;  %v2307_v13 = vunpack.c.l.b16 %v296_v61  ;;  %v2309_v14 = vunpack.c.h.b16 %v296_v61  ;;  %v1970_v16 = vld [vmem:[%s2526_s1 + $0x60] sm:$0xff] }
  0x20   : > { %682 = vmatpush.bf16.msra.mxu0 %v1992_v20  ;;  %v301_v0 = vld [vmem:[#allocation2 + $0x8] sm:$0x11]  ;;  %v293_v1 = vsel %vm291_vm0, %v273_v54, %v292_v63  ;;  %v1978_v20 = vld [vmem:[%s2526_s1 + $0xa0] sm:$0xff]  ;;  %v1969_v30 = vld [vmem:[%s2526_s1 + $0x58] sm:$0xff] }
  0x21   : > { %695 = vmatpush.bf16.msra.mxu1 %v2000_v22  ;;  %v302_v4 = vsel %vm2192_vm8, %v282_v57, %v301_v0  ;;  %294 = vst [vmem:[#allocation2 + $0x10] sm:$0xff] %v293_v1  ;;  %v298_v5 = vld [vmem:[#allocation2 + $0x18] sm:$0x11]  ;;  %v2319_v18 = vunpack.c.l.b16 %v293_v1  ;;  %v2321_v19 = vunpack.c.h.b16 %v293_v1  ;;  %v1986_v21 = vld [vmem:[%s2526_s1 + $0xe0] sm:$0xff]  ;;  %v1960_v45 = vld [vmem:[%s2526_s1 + $0x10] sm:$0xff] }
  0x22   : > { %708 = vmatpush.bf16.msra.mxu2 %v2008_v24  ;;  %303 = vst [vmem:[#allocation2 + $0x8] sm:$0x11] %v302_v4  ;;  %v299_v8 = vsel %vm2192_vm8, %v281_v62, %v298_v5  ;;  %v1985_v34 = vld [vmem:[%s2526_s1 + $0xd8] sm:$0xff]  ;;  %v1968_v46 = vld [vmem:[%s2526_s1 + $0x50] sm:$0xff]  ;;  %v1975_v57 = vld [vmem:[%s2526_s1 + $0x88] sm:$0xff] }
  0x23   : > { %721 = vmatpush.bf16.msra.mxu3 %v2016_v25  ;;  %300 = vst [vmem:[#allocation2 + $0x18] sm:$0x11] %v299_v8  ;;  %v1983_v58 = vld [vmem:[%s2526_s1 + $0xc8] sm:$0xff]  ;;  %v1974_v61 = vld [vmem:[%s2526_s1 + $0x80] sm:$0xff]  ;;  %v2029_v63 = vld [vmem:[%s2526_s1 + $0x238] sm:$0xff]  ;;  %v732_v8 = vpack.c.b16 %v2309_v14, %v2309_v14 }
  0x24   : > { %683 = vmatpush.bf16.msra.mxu0 %v1991_v28  ;;  %v1982_v62 = vld [vmem:[%s2526_s1 + $0xc0] sm:$0xff]  ;;  %v2037_v0 = vld [vmem:[%s2526_s1 + $0x278] sm:$0xff]  ;;  %v2036_v4 = vld [vmem:[%s2526_s1 + $0x270] sm:$0xff] }
  0x25   : > { %696 = vmatpush.bf16.msra.mxu1 %v1999_v29  ;;  %v1961_v29 = vld [vmem:[%s2526_s1 + $0x18] sm:$0xff]  ;;  %v2044_v5 = vld [vmem:[%s2526_s1 + $0x2b0] sm:$0xff] }
  0x26   : > { %709 = vmatpush.bf16.msra.mxu2 %v2007_v33  ;;  %v1977_v33 = vld [vmem:[%s2526_s1 + $0x98] sm:$0xff] }
  0x27   : > { %722 = vmatpush.bf16.msra.mxu3 %v2015_v38  ;;  %v2045_v1 = vld [vmem:[%s2526_s1 + $0x2b8] sm:$0xff] }
  0x28   : > { %684 = vmatpush.bf16.msra.mxu0 %v1990_v50  ;;  %v1976_v50 = vld [vmem:[%s2526_s1 + $0x90] sm:$0xff] }
  0x29   : > { %697 = vmatpush.bf16.msra.mxu1 %v1998_v51  ;;  %v2317_v17 = vld [vmem:[#allocation2 + $0x8] sm:$0x11]  ;;  %v1984_v51 = vld [vmem:[%s2526_s1 + $0xd0] sm:$0xff] }
  0x2a   : > { %710 = vmatpush.bf16.msra.mxu2 %v2006_v52  ;;  %v447_v22 = vunpack.c.l.b16 %v2317_v17  ;;  %v2330_v23 = vld [vmem:[#allocation2 + $0x18] sm:$0x11]  ;;  %v448_v24 = vunpack.c.h.b16 %v2317_v17 }
  0x2b   : > { %723 = vmatpush.bf16.msra.mxu3 %v2014_v53  ;;  %v445_v25 = vunpack.c.l.b16 %v2330_v23  ;;  %v446_v26 = vunpack.c.h.b16 %v2330_v23  ;;  %v2038_v23 = vld [vmem:[%s2526_s1 + $0x280] sm:$0xff] }
  0x2c   : > { %929 = vmatpush.bf16.msrb.mxu0 %v1965_v55  ;;  %v451_v27 = vpack.c.b16 %v447_v22, %v2307_v13  ;;  %v452_v28 = vpack.c.b16 %v448_v24, %v2309_v14  ;;  %v1959_v55 = vld [vmem:[%s2526_s1 + $0x8] sm:$0xff]  ;;  %v730_v14 = vpack.c.b16 %v2321_v19, %v2321_v19 }
  0x2d   : > { %942 = vmatpush.bf16.msrb.mxu1 %v1973_v56  ;;  %v449_v31 = vpack.c.b16 %v445_v25, %v2319_v18  ;;  %v450_v32 = vpack.c.b16 %v446_v26, %v2321_v19  ;;  %v1967_v56 = vld [vmem:[%s2526_s1 + $0x48] sm:$0xff]  ;;  %v2050_v19 = vld [vmem:[%s2526_s1 + $0x2e0] sm:$0xff] }
  0x2e   : > { %955 = vmatpush.bf16.msrb.mxu2 %v1981_v59  ;;  %v468_v35 = vshrl.u32 %v451_v27, 16  ;;  %v470_v36 = vshll.u32 %v451_v27, 16  ;;  %v475_v37 = vshrl.u32 %v452_v28, 16  ;;  %v477_v38 = vshll.u32 %v452_v28, 16  ;;  %v1958_v59 = vld [vmem:[%s2526_s1] sm:$0xff]  ;;  %v2041_v27 = vld [vmem:[%s2526_s1 + $0x298] sm:$0xff] }
  0x2f   : > { %968 = vmatpush.bf16.msrb.mxu3 %v1989_v60  ;;  %v454_v39 = vshrl.u32 %v449_v31, 16  ;;  %v456_v40 = vshll.u32 %v449_v31, 16  ;;  %v461_v41 = vshrl.u32 %v450_v32, 16  ;;  %v463_v42 = vshll.u32 %v450_v32, 16  ;;  %v1966_v60 = vld [vmem:[%s2526_s1 + $0x40] sm:$0xff]  ;;  %v2049_v28 = vld [vmem:[%s2526_s1 + $0x2d8] sm:$0xff] }
  0x30   : > { %930 = vmatpush.bf16.msrb.mxu0 %v1964_v2  ;;  %v472_v43 = vrot.slane %v470_v36, 1  ;;  %v479_v44 = vrot.slane %v477_v38, 1  ;;  %v2053_v2 = vld [vmem:[%s2526_s1 + $0x2f8] sm:$0xff]  ;;  %v981_v31 = vld [vmem:[#allocation2 + $0x10] sm:$0xee]  ;;  %v2031_v38 = vld [vmem:[%s2526_s1 + $0x248] sm:$0xff] }
  0x31   : > { %943 = vmatpush.bf16.msrb.mxu1 %v1972_v3  ;;  %v458_v47 = vrot.slane %v456_v40, 1  ;;  %v465_v48 = vrot.slane %v463_v42, 1  ;;  %v2028_v3 = vld [vmem:[%s2526_s1 + $0x230] sm:$0xff]  ;;  %v1051_v36 = vunpack.c.h.b16 %v981_v31  ;;  %v2047_v42 = vld [vmem:[%s2526_s1 + $0x2c8] sm:$0xff] }
  0x32   : > { %956 = vmatpush.bf16.msrb.mxu2 %v1980_v6  ;;  %v473_v49 = vor.u32 %v472_v43, %v468_v35  ;;  %v480_v52 = vor.u32 %v479_v44, %v475_v37  ;;  %v2052_v6 = vld [vmem:[%s2526_s1 + $0x2f0] sm:$0xff]  ;;  %v1050_v35 = vunpack.c.l.b16 %v981_v31  ;;  %v2023_v37 = vld [vmem:[%s2526_s1 + $0x208] sm:$0xff] }
  0x33   : > { %969 = vmatpush.bf16.msrb.mxu3 %v1988_v7  ;;  %v459_v53 = vor.u32 %v458_v47, %v454_v39  ;;  %v466_v54 = vor.u32 %v465_v48, %v461_v41  ;;  %v731_v7 = vpack.c.b16 %v2307_v13, %v2307_v13  ;;  %v729_v13 = vpack.c.b16 %v2319_v18, %v2319_v18  ;;  %v2042_v18 = vld [vmem:[%s2526_s1 + $0x2a0] sm:$0xff]  ;;  %v2040_v32 = vld [vmem:[%s2526_s1 + $0x290] sm:$0xff]  ;;  %v2039_v41 = vld [vmem:[%s2526_s1 + $0x288] sm:$0xff] }
  0x34   : > { %931 = vmatpush.bf16.msrb.mxu0 %v1963_v9  ;;  %711 = vmatmul.bf16.vlgmr.msra.gmra.mxu2 %v473_v49  ;;  %v2027_v9 = vld [vmem:[%s2526_s1 + $0x228] sm:$0xff]  ;;  %v1054_v43 = vpack.c.b16 %v445_v25, %v1050_v35  ;;  %v1055_v44 = vpack.c.b16 %v446_v26, %v1051_v36  ;;  %v2046_v25 = vld [vmem:[%s2526_s1 + $0x2c0] sm:$0xff] }
  0x35   : > { %944 = vmatpush.bf16.msrb.mxu1 %v1971_v10  ;;  %724 = vmatmul.bf16.vlgmr.msra.gmra.mxu3 %v480_v52  ;;  %v2035_v10 = vld [vmem:[%s2526_s1 + $0x268] sm:$0xff] }
  0x36   : > { %957 = vmatpush.bf16.msrb.mxu2 %v1979_v11  ;;  %685 = vmatmul.bf16.vlgmr.msra.gmra.mxu0 %v459_v53  ;;  %v2043_v11 = vld [vmem:[%s2526_s1 + $0x2a8] sm:$0xff]  ;;  %v1058_v26 = vrot.slane %v1054_v43, 1  ;;  %v1059_v49 = vrot.slane %v1055_v44, 1 }
  0x37   : > { %970 = vmatpush.bf16.msrb.mxu3 %v1987_v12  ;;  %698 = vmatmul.bf16.vlgmr.msra.gmra.mxu1 %v466_v54  ;;  %v2051_v12 = vld [vmem:[%s2526_s1 + $0x2e8] sm:$0xff] }
  0x38   : > { %932 = vmatpush.bf16.msrb.mxu0 %v1962_v15  ;;  %v2026_v15 = vld [vmem:[%s2526_s1 + $0x220] sm:$0xff] }
  0x39   : > { %945 = vmatpush.bf16.msrb.mxu1 %v1970_v16  ;;  %v2034_v16 = vld [vmem:[%s2526_s1 + $0x260] sm:$0xff] }
  0x3a   : > { %958 = vmatpush.bf16.msrb.mxu2 %v1978_v20  ;;  %v2025_v20 = vld [vmem:[%s2526_s1 + $0x218] sm:$0xff] }
  0x3b   : > { %971 = vmatpush.bf16.msrb.mxu3 %v1986_v21  ;;  %v2033_v21 = vld [vmem:[%s2526_s1 + $0x258] sm:$0xff] }
  0x3c   : > { %933 = vmatpush.bf16.msrb.mxu0 %v1961_v29  ;;  %v2024_v29 = vld [vmem:[%s2526_s1 + $0x210] sm:$0xff] }
  0x3d   : > { %946 = vmatpush.bf16.msrb.mxu1 %v1969_v30  ;;  %v2032_v30 = vld [vmem:[%s2526_s1 + $0x250] sm:$0xff] }
  0x3e   : > { %959 = vmatpush.bf16.msrb.mxu2 %v1977_v33  ;;  %v2048_v33 = vld [vmem:[%s2526_s1 + $0x2d0] sm:$0xff] }
  0x3f   : > { %972 = vmatpush.bf16.msrb.mxu3 %v1985_v34  ;;  %v982_v34 = vld [vmem:[#allocation2] sm:$0xee] }
  0x40   : > { %934 = vmatpush.bf16.msrb.mxu0 %v1960_v45  ;;  %v1052_v39 = vunpack.c.l.b16 %v982_v34  ;;  %v1053_v40 = vunpack.c.h.b16 %v982_v34  ;;  %v2022_v45 = vld [vmem:[%s2526_s1 + $0x200] sm:$0xff] }
  0x41   : > { %947 = vmatpush.bf16.msrb.mxu1 %v1968_v46  ;;  %v2030_v46 = vld [vmem:[%s2526_s1 + $0x240] sm:$0xff] }
  0x42   : > { %960 = vmatpush.bf16.msrb.mxu2 %v1976_v50  ;;  %v1056_v47 = vpack.c.b16 %v447_v22, %v1052_v39  ;;  %v1057_v48 = vpack.c.b16 %v448_v24, %v1053_v40 }
  0x43   : > { %973 = vmatpush.bf16.msrb.mxu3 %v1984_v51 }
  0x44   : > { %935 = vmatpush.bf16.msrb.mxu0 %v1959_v55  ;;  %v1060_v50 = vrot.slane %v1056_v47, 1  ;;  %v1061_v51 = vrot.slane %v1057_v48, 1 }
  0x45   : > { %948 = vmatpush.bf16.msrb.mxu1 %v1967_v56 }
  0x46   : > { %961 = vmatpush.bf16.msrb.mxu2 %v1975_v57 }
  0x47   : > { %974 = vmatpush.bf16.msrb.mxu3 %v1983_v58 }
  0x48   : > { %936 = vmatpush.bf16.msrb.mxu0 %v1958_v59 }
  0x49   : > { %949 = vmatpush.bf16.msrb.mxu1 %v1966_v60 }
  0x4a   : > { %962 = vmatpush.bf16.msrb.mxu2 %v1974_v61 }
  0x4b   : > { %975 = vmatpush.bf16.msrb.mxu3 %v1982_v62  ;;  %937 = vmatmul.bf16.vlgmr.msrb.gmra.mxu0 %v729_v13 }
  0x4c   : > { %1258 = vmatpush.bf16.msra.mxu0 %v2029_v63  ;;  %950 = vmatmul.bf16.vlgmr.msrb.gmra.mxu1 %v730_v14 }
  0x4d   : > { %1271 = vmatpush.bf16.msra.mxu1 %v2037_v0  ;;  %963 = vmatmul.bf16.vlgmr.msrb.gmra.mxu2 %v731_v7 }
  0x4e   : > { %1284 = vmatpush.bf16.msra.mxu2 %v2045_v1  ;;  %976 = vmatmul.bf16.vlgmr.msrb.gmra.mxu3 %v732_v8 }
  0x4f   : > { %1297 = vmatpush.bf16.msra.mxu3 %v2053_v2 }
  0x50   : > { %1259 = vmatpush.bf16.msra.mxu0 %v2028_v3 }
  0x51   : > { %1272 = vmatpush.bf16.msra.mxu1 %v2036_v4 }
  0x52   : > { %1285 = vmatpush.bf16.msra.mxu2 %v2044_v5 }
  0x53   : > { %1298 = vmatpush.bf16.msra.mxu3 %v2052_v6 }
  0x54   : > { %1260 = vmatpush.bf16.msra.mxu0 %v2027_v9 }
  0x55   : > { %1273 = vmatpush.bf16.msra.mxu1 %v2035_v10 }
  0x56   : > { %1286 = vmatpush.bf16.msra.mxu2 %v2043_v11 }
  0x57   : > { %1299 = vmatpush.bf16.msra.mxu3 %v2051_v12 }
  0x58   : > { %1261 = vmatpush.bf16.msra.mxu0 %v2026_v15 }
  0x59   : > { %1274 = vmatpush.bf16.msra.mxu1 %v2034_v16 }
  0x5a   : > { %1287 = vmatpush.bf16.msra.mxu2 %v2042_v18  ;;  %v2062_v18 = vld [vmem:[%s2527_s2] ss:$0 sm:$0xff] }
  0x5b   : > { %1300 = vmatpush.bf16.msra.mxu3 %v2050_v19 }
  0x5c   : > { %1262 = vmatpush.bf16.msra.mxu0 %v2025_v20 }
  0x5d   : > { %1275 = vmatpush.bf16.msra.mxu1 %v2033_v21 }
  0x5e   : > { %1288 = vmatpush.bf16.msra.mxu2 %v2041_v27 }
  0x5f   : > { %1301 = vmatpush.bf16.msra.mxu3 %v2049_v28 }
  0x60   : > { %1263 = vmatpush.bf16.msra.mxu0 %v2024_v29 }
  0x61   : > { %1276 = vmatpush.bf16.msra.mxu1 %v2032_v30 }
  0x62   : > { %1289 = vmatpush.bf16.msra.mxu2 %v2040_v32 }
  0x63   : > { %1302 = vmatpush.bf16.msra.mxu3 %v2048_v33 }
  0x64   : > { %1264 = vmatpush.bf16.msra.mxu0 %v2023_v37 }
  0x65   : > { %1277 = vmatpush.bf16.msra.mxu1 %v2031_v38 }
  0x66   : > { %1290 = vmatpush.bf16.msra.mxu2 %v2039_v41 }
  0x67   : > { %1303 = vmatpush.bf16.msra.mxu3 %v2047_v42 }
  0x68   : > { %1265 = vmatpush.bf16.msra.mxu0 %v2022_v45 }
  0x69   : > { %1278 = vmatpush.bf16.msra.mxu1 %v2030_v46 }
  0x6a   : > { %1291 = vmatpush.bf16.msra.mxu2 %v2038_v23 }
  0x6b   : > { %1304 = vmatpush.bf16.msra.mxu3 %v2046_v25  ;;  %1266 = vmatmul.bf16.vlgmr.msra.gmra.mxu0 %v1058_v26 }
  0x6c   : > { %1279 = vmatmul.bf16.vlgmr.msra.gmra.mxu1 %v1059_v49 }
  0x6d   : > { %1292 = vmatmul.bf16.vlgmr.msra.gmra.mxu2 %v1060_v50 }
  0x6e   : > { %1305 = vmatmul.bf16.vlgmr.msra.gmra.mxu3 %v1061_v51 }
  0xb3   : > { %v686_v17 = vpop.f32.mrf.mxu0 }
  0xb4   : > { %v699_v22 = vpop.f32.mrf.mxu1 }
  0xb5   : > { %v700_v61 = vadd.f32 %v699_v22, %v686_v17 }
  0xb7   : > { %v712_v24 = vpop.f32.mrf.mxu2 }
  0xb8   : > { %v725_v52 = vpop.f32.mrf.mxu3  ;;  %v713_v2 = vadd.f32 %v712_v24, %v700_v61 }
  0xba   : > { %v726_v3 = vadd.f32 %v725_v52, %v713_v2 }
  0xbb   : > { %v688_v53 = vpop.f32.mrf.mxu0 }
  0xbc   : > { %v701_v54 = vpop.f32.mrf.mxu1 }
  0xbf   : > { %v714_v55 = vpop.f32.mrf.mxu2 }
  0xc0   : > { %v727_v56 = vpop.f32.mrf.mxu3 }
  0xc8   : > { %v938_v57 = vpop.f32.mrf.mxu0 }
  0xc9   : > { %v951_v58 = vpop.f32.mrf.mxu1  ;;  %v939_v4 = vadd.f32 %v938_v57, %v726_v3 }
  0xcb   : > { %v952_v7 = vadd.f32 %v951_v58, %v939_v4 }
  0xd0   : > { %v964_v59 = vpop.f32.mrf.mxu2  ;;  %v940_v62 = vpop.f32.mrf.mxu0 }
  0xd1   : > { %v977_v60 = vpop.f32.mrf.mxu3  ;;  %v953_v63 = vpop.f32.mrf.mxu1  ;;  %v965_v9 = vadd.f32 %v964_v59, %v952_v7 }
  0xd3   : > { %v978_v15 = vadd.f32 %v977_v60, %v965_v9 }
  0xd8   : > { %v966_v0 = vpop.f32.mrf.mxu2 }
  0xd9   : > { %v979_v1 = vpop.f32.mrf.mxu3 }
  0xe8   : > { %v1267_v5 = vpop.f32.mrf.mxu0 }
  0xe9   : > { %v1280_v6 = vpop.f32.mrf.mxu1 }
  0xea   : > { %v1281_v8 = vadd.f32 %v1280_v6, %v1267_v5 }
  0xf0   : > { %v1293_v10 = vpop.f32.mrf.mxu2  ;;  %v1269_v13 = vpop.f32.mrf.mxu0 }
  0xf1   : > { %v1306_v11 = vpop.f32.mrf.mxu3  ;;  %v1294_v12 = vadd.f32 %v1293_v10, %v1281_v8  ;;  %v1282_v14 = vpop.f32.mrf.mxu1 }
  0xf3   : > { %v1307_v16 = vadd.f32 %v1306_v11, %v1294_v12 }
  0xf5   : > { %v1310_v19 = vadd.f32 %v1307_v16, %v978_v15 }
  0xf7   : > { %v1315_v20 = vmul.f32 %v2062_v18, %v1310_v19 }
  0xf8   : > { %v1295_v21 = vpop.f32.mrf.mxu2 }
  0xf9   : > { %v1308_v27 = vpop.f32.mrf.mxu3  ;;  %v1316_v28 = vrot.slane %v1315_v20, 4  ;;  %v1323_v29 = vmul.f32 %v1315_v20, %v1315_v20  ;;  %1331 = vst [vmem:[%s233_s12] sm:$0xff] %v1315_v20 }
  0xfb   : > { %v1317_v30 = vadd.f32 %v1316_v28, %v1315_v20  ;;  %v1324_v31 = vrot.slane %v1323_v29, 4 }
  0xfd   : > { %v1318_v32 = vrot.slane %v1317_v30, 2  ;;  %v1325_v33 = vadd.f32 %v1324_v31, %v1323_v29 }
  0xff   : > { %v1319_v34 = vadd.f32 %v1318_v32, %v1317_v30  ;;  %v1326_v35 = vrot.slane %v1325_v33, 2 }
 0x101   : > { %v1320_v36 = vrot.slane %v1319_v34, 1  ;;  %v1327_v37 = vadd.f32 %v1326_v35, %v1325_v33 }
 0x103   : > { %v1321_v38 = vadd.f32 %v1320_v36, %v1319_v34  ;;  %v1328_v39 = vrot.slane %v1327_v37, 1 }
 0x105   : > { %1322 = vst [vmem:[%s236_s15] sm:$0x1] %v1321_v38  ;;  %v1329_v40 = vadd.f32 %v1328_v39, %v1327_v37 }
 0x107   : > { %1330 = vst [vmem:[%s239_s20] sm:$0x1] %v1329_v40 }
 0x108 PF: > { %s16_s18 = sadd.s32 1, %s2069_s18  }
 0x109   : > { %p13_p4 = scmp.ge.s32.totalorder %s16_s18, 4  }
 0x10b   :  { %15 = sbr.rel (!%p13_p4) target bundleno = 1 (0x1), region = 88 }

// kernel: basic_block_forward.5
= control target key start
LH: loop header
LB: loop body
LE: loop exit
PB: predicated region body
PF: predicated region fallthrough
CT: control target
= control target key end

     0   :  { %s420_s18 = smov 0   ;;  %s457_s0 = inlined_call_operand.vmem [shape: f32[2,8,128], index: 0, kind: input, shape index: {}]   ;;  %s458_s1 = inlined_call_operand.vmem [shape: bf16[2,8,512], index: 1, kind: input, shape index: {}]   ;;  %s459_s2 = inlined_call_operand.vmem [shape: f32[1,128], index: 2, kind: input, shape index: {}]   ;;  %s460_s3 = inlined_call_operand.vmem [shape: f32[1,128], index: 3, kind: input, shape index: {}]   ;;  %s461_s4 = inlined_call_operand.vmem [shape: f32[1,512], index: 4, kind: input, shape index: {}]   ;;  %s462_s5 = inlined_call_operand.vmem [shape: bf16[2,8,512], index: 5, kind: output, shape index: {}]  }
   0x1 LB: > { %s356_s19 = sadd.s32 4294967295, %s387_s18   ;;  %p360_p0 = scmp.ge.s32.totalorder %s387_s18, 1  ;;  %s387_s18 = sphi %s420_s18, %s15_s18  }
   0x2   : > { %p196_p1 = scmp.lt.s32.totalorder %s387_s18, 3 }
   0x4   : > { %p197_p2 = pnand %p360_p0, %p196_p1 }
   0x5   : > { %p228_p3 = scmp.lt.s32.totalorder (!%p197_p2), %s356_s19, 1 }
   0x6   : > { %200 = sbr.rel (%p197_p2) target bundleno = 29 (0x1d), region = 40 }
   0xb   : > { %s464_s19 = smov (!%p228_p3, %s356_s19), 1  ;;  %v379_v0 = vld [vmem:[%s459_s2] ss:$0 sm:$0xff]  ;;  %v389_v20 = vmov -1.0  }
   0xc   : > { %v253_v1 = vld [vmem:[%s461_s4] sm:$0xf]  ;;  %s361_s24 = sshll.u32 %s464_s19, 3  ;;  %s368_s25 = sshll.u32 %s464_s19, 4 }
   0xd   : > { %s231_s28 = scalar_lea.vmem %s457_s0, %s361_s24  ;;  %s236_s6 = scalar_lea.vmem %s458_s1, %s368_s25  ;;  %v380_v2 = vld [vmem:[%s460_s3] ss:$0 sm:$0xff]  ;;  %v255_v4 = vperm.slane %v253_v1, 0  ;;  %v256_v6 = vperm.slane %v253_v1, 1  ;;  %v257_v9 = vperm.slane %v253_v1, 2  ;;  %v258_v10 = vperm.slane %v253_v1, 3 }
   0xe   : > { %v242_v3 = vld [vmem:[%s231_s28] sm:$0xff]  ;;  %v276_v8 = vld [vmem:[%s236_s6 + $0x8] sm:$0xff]  ;;  %s241_s11 = scalar_lea.vmem %s462_s5, %s368_s25 }
   0xf   : > { %v247_v5 = vmul.f32 %v379_v0, %v242_v3  ;;  %v275_v7 = vld [vmem:[%s236_s6] sm:$0xff]  ;;  %v279_v14 = vunpack.c.l.bf16 %v276_v8  ;;  %v280_v15 = vunpack.c.h.bf16 %v276_v8 }
  0x10   : > { %v277_v12 = vunpack.c.l.bf16 %v275_v7  ;;  %v278_v13 = vunpack.c.h.bf16 %v275_v7 }
  0x11   : > { %v252_v11 = vadd.f32 %v380_v2, %v247_v5 }
  0x13   : > { %v263_v16 = vadd.f32 %v255_v4, %v252_v11  ;;  %v264_v17 = vadd.f32 %v256_v6, %v252_v11  ;;  %v265_v18 = vadd.f32 %v257_v9, %v252_v11  ;;  %v266_v19 = vadd.f32 %v258_v10, %v252_v11 }
  0x15   : > { %vm267_vm0 = vcmp.ge.f32.partialorder %v263_v16, 0.0  ;;  %vm268_vm1 = vcmp.ge.f32.partialorder %v264_v17, 0.0  ;;  %vm269_vm2 = vcmp.ge.f32.partialorder %v265_v18, 0.0  ;;  %vm270_vm3 = vcmp.ge.f32.partialorder %v266_v19, 0.0 }
  0x16   : > { %v271_v21 = vsel %vm267_vm0, 1.0, %v389_v20  ;;  %v272_v22 = vsel %vm268_vm1, 1.0, %v389_v20  ;;  %v273_v23 = vsel %vm269_vm2, 1.0, %v389_v20  ;;  %v274_v24 = vsel %vm270_vm3, 1.0, %v389_v20 }
  0x17   : > { %v281_v25 = vmul.f32 %v277_v12, %v271_v21  ;;  %v282_v26 = vmul.f32 %v278_v13, %v272_v22  ;;  %v283_v27 = vmul.f32 %v279_v14, %v273_v23  ;;  %v284_v28 = vmul.f32 %v280_v15, %v274_v24 }
  0x19   : > { %v285_v29 = vpack.c.bf16 %v282_v26, %v281_v25  ;;  %v286_v30 = vpack.c.bf16 %v284_v28, %v283_v27 }
  0x1b   : > { %287 = vst [vmem:[%s241_s11] sm:$0xff] %v285_v29 }
  0x1c   : > { %288 = vst [vmem:[%s241_s11 + $0x8] sm:$0xff] %v286_v30 }
  0x1d PF: > { %s15_s18 = sadd.s32 1, %s387_s18  }
  0x1e   : > { %p12_p4 = scmp.ge.s32.totalorder %s15_s18, 4  }
  0x20   :  { %14 = sbr.rel (!%p12_p4) target bundleno = 1 (0x1), region = 73 }

// kernel: basic_block_forward.7
= control target key start
LH: loop header
LB: loop body
LE: loop exit
PB: predicated region body
PF: predicated region fallthrough
CT: control target
= control target key end

     0   :  { %s456_s18 = smov 0   ;;  %s493_s0 = inlined_call_operand.vmem [shape: f32[2,8,128], index: 0, kind: input, shape index: {}]   ;;  %s494_s1 = inlined_call_operand.vmem [shape: bf16[2,8,512], index: 1, kind: input, shape index: {}]   ;;  %s495_s2 = inlined_call_operand.vmem [shape: f32[1,128], index: 2, kind: input, shape index: {}]   ;;  %s496_s3 = inlined_call_operand.vmem [shape: f32[1,128], index: 3, kind: input, shape index: {}]   ;;  %s497_s4 = inlined_call_operand.vmem [shape: f32[1,512], index: 4, kind: input, shape index: {}]   ;;  %s498_s5 = inlined_call_operand.vmem [shape: bf16[2,8,512], index: 5, kind: output, shape index: {}]  }
   0x1 LB: > { %s388_s19 = sadd.s32 4294967295, %s423_s18   ;;  %p392_p0 = scmp.ge.s32.totalorder %s423_s18, 1  ;;  %s423_s18 = sphi %s456_s18, %s15_s18  }
   0x2   : > { %p196_p1 = scmp.lt.s32.totalorder %s423_s18, 3 }
   0x4   : > { %p197_p2 = pnand %p392_p0, %p196_p1 }
   0x5   : > { %p228_p3 = scmp.lt.s32.totalorder (!%p197_p2), %s388_s19, 1 }
   0x6   : > { %200 = sbr.rel (%p197_p2) target bundleno = 41 (0x29), region = 40 }
   0xb   : > { %s500_s19 = smov (!%p228_p3, %s388_s19), 1  ;;  %v415_v0 = vld [vmem:[%s495_s2] ss:$0 sm:$0xff]  ;;  %v425_v26 = vmov -1.0  }
   0xc   : > { %v253_v1 = vld [vmem:[%s497_s4] sm:$0xf]  ;;  %s393_s24 = sshll.u32 %s500_s19, 3  ;;  %s404_s25 = sshll.u32 %s500_s19, 4 }
   0xd   : > { %s231_s28 = scalar_lea.vmem %s493_s0, %s393_s24  ;;  %s236_s6 = scalar_lea.vmem %s494_s1, %s404_s25  ;;  %v416_v2 = vld [vmem:[%s496_s3] ss:$0 sm:$0xff]  ;;  %v255_v4 = vperm.slane %v253_v1, 0  ;;  %v256_v8 = vperm.slane %v253_v1, 1  ;;  %v257_v13 = vperm.slane %v253_v1, 2  ;;  %v258_v14 = vperm.slane %v253_v1, 3 }
   0xe   : > { %v242_v3 = vld [vmem:[%s231_s28] sm:$0xff]  ;;  %v276_v6 = vld [vmem:[%s236_s6 + $0x8] sm:$0xff]  ;;  %s241_s11 = scalar_lea.vmem %s498_s5, %s404_s25 }
   0xf   : > { %v275_v5 = vld [vmem:[%s236_s6] sm:$0xff]  ;;  %v247_v7 = vmul.f32 %v415_v0, %v242_v3  ;;  %v279_v11 = vunpack.c.l.bf16 %v276_v6  ;;  %v280_v12 = vunpack.c.h.bf16 %v276_v6 }
  0x10   : > { %v277_v9 = vunpack.c.l.bf16 %v275_v5  ;;  %v278_v10 = vunpack.c.h.bf16 %v275_v5 }
  0x11   : > { %v252_v15 = vadd.f32 %v416_v2, %v247_v7  ;;  %v291_v20 = vadd.f32 1.0, %v279_v11  ;;  %v292_v21 = vadd.f32 1.0, %v280_v12 }
  0x12   : > { %v289_v16 = vadd.f32 1.0, %v277_v9  ;;  %v290_v17 = vadd.f32 1.0, %v278_v10 }
  0x13   : > { %v263_v18 = vadd.f32 %v255_v4, %v252_v15  ;;  %v264_v19 = vadd.f32 %v256_v8, %v252_v15  ;;  %v265_v22 = vadd.f32 %v257_v13, %v252_v15  ;;  %v266_v23 = vadd.f32 %v258_v14, %v252_v15 }
  0x14   : > { %v293_v24 = vmul.f32 0.5, %v289_v16  ;;  %v294_v25 = vmul.f32 0.5, %v290_v17  ;;  %v295_v33 = vmul.f32 0.5, %v291_v20  ;;  %v296_v34 = vmul.f32 0.5, %v292_v21 }
  0x15   : > { %vm267_vm0 = vcmp.ge.f32.partialorder %v263_v18, 0.0  ;;  %vm268_vm1 = vcmp.ge.f32.partialorder %v264_v19, 0.0  ;;  %vm269_vm2 = vcmp.ge.f32.partialorder %v265_v22, 0.0  ;;  %vm270_vm3 = vcmp.ge.f32.partialorder %v266_v23, 0.0 }
  0x16   : > { %v271_v27 = vsel %vm267_vm0, 1.0, %v425_v26  ;;  %v272_v28 = vsel %vm268_vm1, 1.0, %v425_v26  ;;  %v273_v31 = vsel %vm269_vm2, 1.0, %v425_v26  ;;  %v274_v32 = vsel %vm270_vm3, 1.0, %v425_v26 }
  0x17   : > { %v281_v29 = vadd.f32 1.0, %v271_v27  ;;  %v282_v30 = vadd.f32 1.0, %v272_v28  ;;  %v283_v35 = vadd.f32 1.0, %v273_v31  ;;  %v284_v36 = vadd.f32 1.0, %v274_v32 }
  0x19   : > { %v285_v37 = vmul.f32 0.5, %v281_v29  ;;  %v286_v38 = vmul.f32 0.5, %v282_v30  ;;  %v287_v39 = vmul.f32 0.5, %v283_v35  ;;  %v288_v40 = vmul.f32 0.5, %v284_v36 }
  0x1b   : > { %v297_v41 = vadd.f32 %v293_v24, %v285_v37  ;;  %v298_v42 = vadd.f32 %v294_v25, %v286_v38  ;;  %v299_v43 = vadd.f32 %v295_v33, %v287_v39  ;;  %v300_v44 = vadd.f32 %v296_v34, %v288_v40 }
  0x1d   : > { %v301_v45 = vmax.f32 %v297_v41, 0.0  ;;  %v302_v46 = vmax.f32 %v298_v42, 0.0  ;;  %v303_v47 = vmax.f32 %v299_v43, 0.0  ;;  %v304_v48 = vmax.f32 %v300_v44, 0.0 }
  0x1f   : > { %v305_v49 = vmin.f32 %v301_v45, 1.0  ;;  %v306_v50 = vmin.f32 %v302_v46, 1.0  ;;  %v307_v51 = vmin.f32 %v303_v47, 1.0  ;;  %v308_v52 = vmin.f32 %v304_v48, 1.0 }
  0x21   : > { %v309_v53 = vmul.f32 2.0, %v305_v49  ;;  %v310_v54 = vmul.f32 2.0, %v306_v50  ;;  %v311_v55 = vmul.f32 2.0, %v307_v51  ;;  %v312_v56 = vmul.f32 2.0, %v308_v52 }
  0x23   : > { %v398_v57 = vadd.f32 -1.0, %v309_v53  ;;  %v399_v58 = vadd.f32 -1.0, %v310_v54  ;;  %v400_v59 = vadd.f32 -1.0, %v311_v55  ;;  %v401_v60 = vadd.f32 -1.0, %v312_v56 }
  0x25   : > { %v317_v61 = vpack.c.bf16 %v399_v58, %v398_v57  ;;  %v318_v62 = vpack.c.bf16 %v401_v60, %v400_v59 }
  0x27   : > { %319 = vst [vmem:[%s241_s11] sm:$0xff] %v317_v61 }
  0x28   : > { %320 = vst [vmem:[%s241_s11 + $0x8] sm:$0xff] %v318_v62 }
  0x29 PF: > { %s15_s18 = sadd.s32 1, %s423_s18  }
  0x2a   : > { %p12_p4 = scmp.ge.s32.totalorder %s15_s18, 4  }
  0x2c   :  { %14 = sbr.rel (!%p12_p4) target bundleno = 1 (0x1), region = 73 }

</bundles_post_ra>
